<compile_context>
chip_gen: v7x
topology: tpu7x:2x2x1
jax: 0.10.0
libtpu: 0.0.40
codegen_flags: <defaults>
</compile_context>

<pallas_src>
import functools
import math

import jax
import jax.numpy as jnp
from jax import lax
from jax.experimental import pallas as pl
from jax.experimental.pallas import tpu as pltpu

LANE = 128  # lane width / padding granularity


def _round_up(x: int, m: int) -> int:
    return ((x + m - 1) // m) * m


def _device_kind() -> str:
    try:
        return jax.devices()[0].device_kind.lower()
    except Exception:
        return ""


def _vmem_ceiling_bytes() -> int:
    kind = _device_kind()
    if "v7" in kind or "7x" in kind:
        return 56 * 1024 * 1024      # v7x: 64 MiB physical per TensorCore
    if "v6" in kind or "v5" in kind or "v4" in kind:
        return 100 * 1024 * 1024     # 128 MiB physical
    return 32 * 1024 * 1024          # unknown generation: safe default


def _vmem_limit_bytes(needed_bytes: int) -> int:
    # Budget from actual buffer sizes (1.5x headroom for double-buffering), capped
    # at a per-generation ceiling, floored at the 32 MiB default so tiny problems
    # never over-request.
    return int(min(_vmem_ceiling_bytes(),
                   max(32 * 1024 * 1024, int(needed_bytes * 1.5))))


def _row_tile(n: int) -> int:
    # 256-row LHS blocks match the 256-wide MXU on v6e/v7x; v5e (128x128) gains
    # nothing from 256.
    kind = _device_kind()
    prefer = 256 if ("v6" in kind or "v7" in kind or "7x" in kind) else 128
    return prefer if n % prefer == 0 else 128


# ----------------------------- MLP (fused linears + ReLU) -----------------------------

def _mlp_kernel(*refs, num_layers: int):
    # refs = (x, w0, b0, ..., w_{L-1}, b_{L-1}, out_0, ..., out_{L-1})
    # out_l (l < L-1): pre-activation of hidden layer l (for h_list);
    # out_{L-1}: final linear output (the PPR teleport state h0).
    x_ref = refs[0]
    wb_refs = refs[1:1 + 2 * num_layers]
    out_refs = refs[1 + 2 * num_layers:]
    h = x_ref[...]
    for l in range(num_layers):
        w = wb_refs[2 * l][...]          # (din_pad, dout_pad), pre-transposed on host
        b = wb_refs[2 * l + 1][...]      # (1, dout_pad)
        y = jnp.dot(h, w, preferred_element_type=jnp.float32) + b
        out_refs[l][...] = y.astype(out_refs[l].dtype)
        if l != num_layers - 1:
            h = jnp.maximum(y, 0.0)      # fused ReLU (dropout = identity in eval)


def pallas_mlp(x_pad, params, *, tm):
    """x_pad: (N_pad, Din_pad) lane/row padded f32. params: [(w, b)] in torch layout.
    Returns a tuple of num_layers padded f32 outputs (hidden pre-acts + final)."""
    n, din_pad = x_pad.shape
    assert n % tm == 0 and din_pad % LANE == 0
    num_layers = len(params)
    nb = n // tm

    args = [x_pad]
    in_specs = [pl.BlockSpec((tm, din_pad), lambda i: (i, 0))]
    out_shape = []
    out_specs = []
    flops = 0
    bytes_accessed = 4 * n * din_pad
    needed = 4 * tm * din_pad
    cur_pad = din_pad
    for w, b in params:
        dout, din = w.shape
        dout_pad = _round_up(dout, LANE)
        assert _round_up(din, LANE) == cur_pad
        # Pre-transpose + zero-pad on the host: no in-kernel transposes; every store
        # is lane-dense. Padded rows/cols are exactly zero.
        wt = jnp.pad(w.T.astype(jnp.float32),
                     ((0, cur_pad - din), (0, dout_pad - dout)))
        bp = jnp.pad(b.astype(jnp.float32), (0, dout_pad - dout)).reshape(1, dout_pad)
        args += [wt, bp]
        in_specs += [pl.BlockSpec((cur_pad, dout_pad), lambda i: (0, 0)),
                     pl.BlockSpec((1, dout_pad), lambda i: (0, 0))]
        out_shape.append(jax.ShapeDtypeStruct((n, dout_pad), jnp.float32))
        out_specs.append(pl.BlockSpec((tm, dout_pad), lambda i: (i, 0)))
        flops += 2 * n * cur_pad * dout_pad
        bytes_accessed += 4 * (cur_pad * dout_pad + dout_pad + n * dout_pad)
        needed += 4 * (cur_pad * dout_pad + dout_pad + 2 * tm * dout_pad)
        cur_pad = dout_pad

    return pl.pallas_call(
        functools.partial(_mlp_kernel, num_layers=num_layers),
        out_shape=tuple(out_shape),
        grid=(nb,),
        in_specs=in_specs,
        out_specs=tuple(out_specs),
        compiler_params=pltpu.CompilerParams(
            dimension_semantics=("parallel",),
            vmem_limit_bytes=_vmem_limit_bytes(2 * needed)),
        cost_estimate=pl.CostEstimate(flops=int(flops), transcendentals=0,
                                      bytes_accessed=int(bytes_accessed)),
    )(*args)


# ------------------------------- PPR propagation ---------------------------------

def _appnp_resident_kernel(a_ref, h0_ref, o_ref, *, k: int, alpha: float):
    # a: (N, N) bf16, already scaled by (1 - alpha); h0: (N, D_pad) f32.
    # Everything stays in VMEM; the k-step PPR loop runs fully on-chip.
    a = a_ref[...]
    h0 = h0_ref[...]
    ah0 = alpha * h0                        # hoisted out of the loop

    def body(_, h):
        return jnp.dot(a, h.astype(jnp.bfloat16),
                       preferred_element_type=jnp.float32) + ah0

    o_ref[...] = lax.fori_loop(0, k, body, h0).astype(o_ref.dtype)


def _appnp_step_kernel(a_ref, hprev_ref, ah0_ref, o_ref):
    # a: (tm, N) bf16 row block, already scaled by (1 - alpha)
    # hprev: (N, D_pad) bf16 resident previous iterate
    # ah0: (tm, D_pad) f32 block of alpha * h0 (pre-scaled on host)
    o_ref[...] = (jnp.dot(a_ref[...], hprev_ref[...],
                          preferred_element_type=jnp.float32)
                  + ah0_ref[...]).astype(o_ref.dtype)


def _propagate_resident(a_scaled, h0, *, k, alpha):
    n, d_pad = h0.shape
    needed = 2 * n * n + 4 * 4 * n * d_pad
    return pl.pallas_call(
        functools.partial(_appnp_resident_kernel, k=k, alpha=alpha),
        out_shape=jax.ShapeDtypeStruct((n, d_pad), jnp.float32),
        grid=(1,),
        in_specs=[pl.BlockSpec((n, n), lambda i: (0, 0)),
                  pl.BlockSpec((n, d_pad), lambda i: (0, 0))],
        out_specs=pl.BlockSpec((n, d_pad), lambda i: (0, 0)),
        compiler_params=pltpu.CompilerParams(
            dimension_semantics=("arbitrary",),
            vmem_limit_bytes=_vmem_limit_bytes(needed)),
        cost_estimate=pl.CostEstimate(
            flops=int(2 * k * n * n * d_pad), transcendentals=0,
            bytes_accessed=int(2 * n * n + 4 * 2 * n * d_pad)),
    )(a_scaled, h0)


def _propagate_streamed(a_scaled, h0, *, k, alpha, tm):
    n, d_pad = h0.shape
    nb = n // tm
    ah0 = alpha * h0                        # pre-scaled teleport term (host-side)
    needed = 2 * (2 * tm * n) + 2 * n * d_pad + 4 * 2 * 2 * tm * d_pad
    step = pl.pallas_call(
        _appnp_step_kernel,
        out_shape=jax.ShapeDtypeStruct((n, d_pad), jnp.float32),
        grid=(nb,),
        in_specs=[
            pl.BlockSpec((tm, n), lambda i: (i, 0)),      # A_hat row block (bf16, streamed)
            pl.BlockSpec((n, d_pad), lambda i: (0, 0)),   # previous iterate (bf16, resident)
            pl.BlockSpec((tm, d_pad), lambda i: (i, 0)),  # alpha * h0 block (f32)
        ],
        out_specs=pl.BlockSpec((tm, d_pad), lambda i: (i, 0)),
        compiler_params=pltpu.CompilerParams(
            # No cross-row-block scratch -> row blocks are independent within one
            # step, so megacore / 2-TC split is legal.
            dimension_semantics=("parallel",),
            vmem_limit_bytes=_vmem_limit_bytes(needed)),
        cost_estimate=pl.CostEstimate(
            flops=int(2 * n * n * d_pad), transcendentals=0,
            bytes_accessed=int(2 * n * n + 2 * n * d_pad + 4 * 2 * n * d_pad)),
    )
    h = h0
    for _ in range(k):
        # Iterate ping-pongs through HBM in bf16 (matches MXU input precision);
        # the extra N*D traffic is negligible vs. the N*N A_hat stream.
        h = step(a_scaled, h.astype(jnp.bfloat16), ah0)
    return h


def pallas_appnp_propagate(a_hat, h0, *, k: int, alpha: float,
                           force_streamed: bool = False):
    """a_hat: (N, N) f32 normalized adjacency (N a multiple of 128).
    h0: (N, D_pad) f32 teleport state. Returns the f32 iterate after k PPR sweeps."""
    n, d_pad = h0.shape
    assert a_hat.shape == (n, n) and n % LANE == 0 and d_pad % LANE == 0
    if k == 0:
        return h0
    # Host-side: fold the (1 - alpha) damping into A and cast to bf16 once.
    a_scaled = ((1.0 - alpha) * a_hat).astype(jnp.bfloat16)

    a_bytes = 2 * n * n
    side_bytes = 4 * 4 * n * d_pad + (4 << 20)   # h0 / iterate / output / temporaries
    if (not force_streamed) and (a_bytes + side_bytes <= _vmem_ceiling_bytes()):
        return _propagate_resident(a_scaled, h0, k=k, alpha=alpha)
    return _propagate_streamed(a_scaled, h0, k=k, alpha=alpha, tm=_row_tile(n))


# ------------------------------ APPNP model ---------------------------------

def init_linear_params(key, in_dim, out_dim):
    # mirrors torch.nn.Linear.reset_parameters (kaiming_uniform a=sqrt(5)):
    # weight, bias ~ U(-1/sqrt(in_dim), 1/sqrt(in_dim))
    kw, kb = jax.random.split(key)
    bound = 1.0 / math.sqrt(in_dim)
    w = jax.random.uniform(kw, (out_dim, in_dim), jnp.float32, -bound, bound)
    b = jax.random.uniform(kb, (out_dim,), jnp.float32, -bound, bound)
    return w, b


def init_appnp_params(key, num_layers, input_dim, hidden_dim, output_dim):
    if num_layers == 1:
        dims = [(input_dim, output_dim)]
    else:
        dims = [(input_dim, hidden_dim)]
        dims += [(hidden_dim, hidden_dim)] * (num_layers - 2)
        dims += [(hidden_dim, output_dim)]
    keys = jax.random.split(key, len(dims))
    return [init_linear_params(k_i, din, dout) for k_i, (din, dout) in zip(keys, dims)]


def appnp_forward(a_hat, feats, params, *, alpha=0.1, k=10):
    """Equivalent of APPNP.forward(g, feats) in eval mode. Returns (h_list, h)."""
    n, din = feats.shape
    n_pad = _round_up(n, LANE)
    din_pad = _round_up(din, LANE)
    # Zero-pad nodes (rows) and features (lanes) once. Pad rows/cols of A_hat are
    # zero, so padded nodes never contaminate real rows; padding is sliced off.
    x = jnp.pad(feats.astype(jnp.float32), ((0, n_pad - n), (0, din_pad - din)))
    a_pad = jnp.pad(a_hat.astype(jnp.float32), ((0, n_pad - n), (0, n_pad - n)))

    # Whole MLP in one pallas_call; collapse to a single grid step at small N
    # (step-overhead-bound regime).
    tm_mlp = n_pad if n_pad <= 1024 else _row_tile(n_pad)
    outs = pallas_mlp(x, params, tm=tm_mlp)

    h_list = [o[:n, :w.shape[0]] for o, (w, _) in zip(outs[:-1], params[:-1])]
    h0 = outs[-1]                                   # (n_pad, dout_pad) f32

    h = pallas_appnp_propagate(a_pad, h0, k=k, alpha=alpha)
    output_dim = params[-1][0].shape[0]
    return h_list, h[:n, :output_dim]


def reference_forward(a_hat, feats, params, *, alpha, k):
    """Pure-JAX reference (mirrors the PyTorch module, eval mode)."""
    h = feats
    h_list = []
    num_layers = len(params)
    for l, (w, b) in enumerate(params):
        h = h @ w.T + b
        if l != num_layers - 1:
            h_list.append(h)
            h = jnp.maximum(h, 0.0)
    h0 = h
    for _ in range(k):
        h = (1.0 - alpha) * (a_hat @ h) + alpha * h0
    return h_list, h


def build_normalized_adjacency(key, n):
    """Random undirected graph -> D^{-1/2} A D^{-1/2} (dense)."""
    raw = jax.random.uniform(key, (n, n))
    adj = (raw + raw.T) * 0.5 > 0.85
    adj = adj.astype(jnp.float32) * (1.0 - jnp.eye(n, dtype=jnp.float32))
    deg = jnp.maximum(adj.sum(axis=1), 1.0)
    d_inv_sqrt = 1.0 / jnp.sqrt(deg)
    return adj * d_inv_sqrt[:, None] * d_inv_sqrt[None, :]


# --------------------------------- main --------------------------------------

if __name__ == "__main__":
    key = jax.random.PRNGKey(0)
    k_feat, k_graph, k_param, k_h0 = jax.random.split(key, 4)

    N = 256
    input_dim, hidden_dim, output_dim = 16, 32, 8
    num_layers = 2
    alpha, k_steps = 0.1, 10

    feats = jax.random.normal(k_feat, (N, input_dim), jnp.float32)
    a_hat = build_normalized_adjacency(k_graph, N)
    params = init_appnp_params(k_param, num_layers, input_dim, hidden_dim, output_dim)

    fwd = jax.jit(functools.partial(appnp_forward, alpha=alpha, k=k_steps))
    h_list, h_out = fwd(a_hat, feats, params)
    jax.block_until_ready(h_out)
    for hl in h_list:
        jax.block_until_ready(hl)

    assert h_out.shape == (N, output_dim)
    assert len(h_list) == num_layers - 1 and h_list[0].shape == (N, hidden_dim)

    # Numerical check against a pure-JAX f32 reference (bf16 A_hat -> small drift).
    ref_list, ref_out = reference_forward(a_hat, feats, params, alpha=alpha, k=k_steps)
    assert jnp.allclose(h_out, ref_out, atol=2e-2, rtol=2e-2)
    for got, ref in zip(h_list, ref_list):
        assert jnp.allclose(got, ref, atol=2e-2, rtol=2e-2)

    # Also exercise the streamed (large-N) propagation path at this small size.
    d_pad = _round_up(output_dim, LANE)
    h0_test = jnp.pad(jax.random.normal(k_h0, (N, output_dim), jnp.float32),
                      ((0, 0), (0, d_pad - output_dim)))
    got_stream = pallas_appnp_propagate(a_hat, h0_test, k=k_steps, alpha=alpha,
                                        force_streamed=True)
    jax.block_until_ready(got_stream)
    ref_stream = h0_test
    for _ in range(k_steps):
        ref_stream = (1.0 - alpha) * (a_hat @ ref_stream) + alpha * h0_test
    assert jnp.allclose(got_stream, ref_stream, atol=2e-2, rtol=2e-2)

    print("KERNEL_OK")
</pallas_src>

<mosaic_0001>
module attributes {stable_mosaic.version = 11 : i64} {
  func.func @_appnp_resident_kernel(%arg0: i32, %arg1: memref<256x256xbf16, #tpu.memory_space<vmem>>, %arg2: memref<256x128xf32, #tpu.memory_space<vmem>>, %arg3: memref<256x128xf32, #tpu.memory_space<vmem>>) attributes {dimension_semantics = [#tpu.dimension_semantics<arbitrary>], iteration_bounds = array<i64: 1>, scalar_prefetch = 0 : i64, scratch_operands = 0 : i64, tpu.core_type = #tpu.core_type<tc>, window_params = [{pipeline_mode = #tpu.pipeline_mode<synchronous>, transform_indices = @transform_0, window_bounds = array<i64: 256, 256>}, {pipeline_mode = #tpu.pipeline_mode<synchronous>, transform_indices = @transform_1, window_bounds = array<i64: 256, 128>}, {pipeline_mode = #tpu.pipeline_mode<synchronous>, transform_indices = @transform_2, window_bounds = array<i64: 256, 128>}]} {
    %c0 = arith.constant 0 : index
    %c0_0 = arith.constant 0 : index
    %0 = vector.load %arg1[%c0, %c0_0] : memref<256x256xbf16, #tpu.memory_space<vmem>>, vector<256x256xbf16>
    %c0_1 = arith.constant 0 : index
    %c0_2 = arith.constant 0 : index
    %1 = vector.load %arg2[%c0_1, %c0_2] : memref<256x128xf32, #tpu.memory_space<vmem>>, vector<256x128xf32>
    %cst = arith.constant 1.000000e-01 : f32
    %2 = vector.broadcast %cst : f32 to vector<256x128xf32>
    %3 = arith.mulf %2, %1 : vector<256x128xf32>
    %c0_i32 = arith.constant 0 : i32
    %c10_i32 = arith.constant 10 : i32
    %4 = arith.addi %c0_i32, %c10_i32 : i32
    %c1_i32 = arith.constant 1 : i32
    %5 = scf.for %arg4 = %c0_i32 to %4 step %c1_i32 iter_args(%arg5 = %1) -> (vector<256x128xf32>)  : i32 {
      %7 = arith.truncf %arg5 : vector<256x128xf32> to vector<256x128xbf16>
      %cst_5 = arith.constant dense<0.000000e+00> : vector<256x128xf32>
      %8 = tpu.matmul %0, %7, %cst_5 {dimension_numbers = #tpu.dot_dimension_numbers<[1], [0], [0], [1], [0, 0, 1, 1], [], []>} : vector<256x256xbf16>, vector<256x128xbf16>, vector<256x128xf32> -> vector<256x128xf32>
      %9 = arith.addf %8, %3 : vector<256x128xf32>
      scf.yield %9 : vector<256x128xf32>
    }
    %c0_3 = arith.constant 0 : index
    %c0_4 = arith.constant 0 : index
    %6 = vector.load %arg3[%c0_3, %c0_4] : memref<256x128xf32, #tpu.memory_space<vmem>>, vector<256x128xf32>
    tpu.vector_store %arg3[%c0_3, %c0_4], %5 {strides = array<i32>} : memref<256x128xf32, #tpu.memory_space<vmem>>, vector<256x128xf32>,
    return
  }
  func.func @transform_0(%arg0: i32) -> (i32, i32) {
    %c0_i32 = arith.constant 0 : i32
    %c0_i32_0 = arith.constant 0 : i32
    %c0_i32_1 = arith.constant 0 : i32
    return %c0_i32, %c0_i32_0 : i32, i32
  }
  func.func @transform_1(%arg0: i32) -> (i32, i32) {
    %c0_i32 = arith.constant 0 : i32
    %c0_i32_0 = arith.constant 0 : i32
    %c0_i32_1 = arith.constant 0 : i32
    return %c0_i32, %c0_i32_0 : i32, i32
  }
  func.func @transform_2(%arg0: i32) -> (i32, i32) {
    %c0_i32 = arith.constant 0 : i32
    %c0_i32_0 = arith.constant 0 : i32
    %c0_i32_1 = arith.constant 0 : i32
    return %c0_i32, %c0_i32_0 : i32, i32
  }
}

module attributes {stable_mosaic.version = 11 : i64} {
  func.func @_mlp_kernel(%arg0: i32, %arg1: memref<256x128xf32, #tpu.memory_space<vmem>>, %arg2: memref<128x128xf32, #tpu.memory_space<vmem>>, %arg3: memref<1x128xf32, #tpu.memory_space<vmem>>, %arg4: memref<128x128xf32, #tpu.memory_space<vmem>>, %arg5: memref<1x128xf32, #tpu.memory_space<vmem>>, %arg6: memref<256x128xf32, #tpu.memory_space<vmem>>, %arg7: memref<256x128xf32, #tpu.memory_space<vmem>>) attributes {dimension_semantics = [#tpu.dimension_semantics<parallel>], iteration_bounds = array<i64: 1>, scalar_prefetch = 0 : i64, scratch_operands = 0 : i64, tpu.core_type = #tpu.core_type<tc>, window_params = [{transform_indices = @transform_0, window_bounds = array<i64: 256, 128>}, {pipeline_mode = #tpu.pipeline_mode<synchronous>, transform_indices = @transform_1, window_bounds = array<i64: 128, 128>}, {pipeline_mode = #tpu.pipeline_mode<synchronous>, transform_indices = @transform_2, window_bounds = array<i64: 1, 128>}, {pipeline_mode = #tpu.pipeline_mode<synchronous>, transform_indices = @transform_3, window_bounds = array<i64: 128, 128>}, {pipeline_mode = #tpu.pipeline_mode<synchronous>, transform_indices = @transform_4, window_bounds = array<i64: 1, 128>}, {transform_indices = @transform_5, window_bounds = array<i64: 256, 128>}, {transform_indices = @transform_6, window_bounds = array<i64: 256, 128>}]} {
    %c0 = arith.constant 0 : index
    %c0_0 = arith.constant 0 : index
    %0 = vector.load %arg1[%c0, %c0_0] : memref<256x128xf32, #tpu.memory_space<vmem>>, vector<256x128xf32>
    %c0_1 = arith.constant 0 : index
    %c0_2 = arith.constant 0 : index
    %1 = vector.load %arg2[%c0_1, %c0_2] : memref<128x128xf32, #tpu.memory_space<vmem>>, vector<128x128xf32>
    %c0_3 = arith.constant 0 : index
    %c0_4 = arith.constant 0 : index
    %2 = vector.load %arg3[%c0_3, %c0_4] : memref<1x128xf32, #tpu.memory_space<vmem>>, vector<1x128xf32>
    %cst = arith.constant dense<0.000000e+00> : vector<256x128xf32>
    %3 = tpu.matmul %0, %1, %cst {dimension_numbers = #tpu.dot_dimension_numbers<[1], [0], [0], [1], [0, 0, 1, 1], [], []>} : vector<256x128xf32>, vector<128x128xf32>, vector<256x128xf32> -> vector<256x128xf32>
    %4 = vector.broadcast %2 : vector<1x128xf32> to vector<256x128xf32>
    %5 = arith.addf %3, %4 : vector<256x128xf32>
    %c0_5 = arith.constant 0 : index
    %c0_6 = arith.constant 0 : index
    %6 = vector.load %arg6[%c0_5, %c0_6] : memref<256x128xf32, #tpu.memory_space<vmem>>, vector<256x128xf32>
    tpu.vector_store %arg6[%c0_5, %c0_6], %5 {strides = array<i32>} : memref<256x128xf32, #tpu.memory_space<vmem>>, vector<256x128xf32>,
    %cst_7 = arith.constant 0.000000e+00 : f32
    %7 = vector.broadcast %cst_7 : f32 to vector<256x128xf32>
    %8 = arith.maximumf %5, %7 : vector<256x128xf32>
    %c0_8 = arith.constant 0 : index
    %c0_9 = arith.constant 0 : index
    %9 = vector.load %arg4[%c0_8, %c0_9] : memref<128x128xf32, #tpu.memory_space<vmem>>, vector<128x128xf32>
    %c0_10 = arith.constant 0 : index
    %c0_11 = arith.constant 0 : index
    %10 = vector.load %arg5[%c0_10, %c0_11] : memref<1x128xf32, #tpu.memory_space<vmem>>, vector<1x128xf32>
    %cst_12 = arith.constant dense<0.000000e+00> : vector<256x128xf32>
    %11 = tpu.matmul %8, %9, %cst_12 {dimension_numbers = #tpu.dot_dimension_numbers<[1], [0], [0], [1], [0, 0, 1, 1], [], []>} : vector<256x128xf32>, vector<128x128xf32>, vector<256x128xf32> -> vector<256x128xf32>
    %12 = vector.broadcast %10 : vector<1x128xf32> to vector<256x128xf32>
    %13 = arith.addf %11, %12 : vector<256x128xf32>
    %c0_13 = arith.constant 0 : index
    %c0_14 = arith.constant 0 : index
    %14 = vector.load %arg7[%c0_13, %c0_14] : memref<256x128xf32, #tpu.memory_space<vmem>>, vector<256x128xf32>
    tpu.vector_store %arg7[%c0_13, %c0_14], %13 {strides = array<i32>} : memref<256x128xf32, #tpu.memory_space<vmem>>, vector<256x128xf32>,
    return
  }
  func.func @transform_0(%arg0: i32) -> (i32, i32) {
    %c0_i32 = arith.constant 0 : i32
    %c0_i32_0 = arith.constant 0 : i32
    return %arg0, %c0_i32 : i32, i32
  }
  func.func @transform_1(%arg0: i32) -> (i32, i32) {
    %c0_i32 = arith.constant 0 : i32
    %c0_i32_0 = arith.constant 0 : i32
    %c0_i32_1 = arith.constant 0 : i32
    return %c0_i32, %c0_i32_0 : i32, i32
  }
  func.func @transform_2(%arg0: i32) -> (i32, i32) {
    %c0_i32 = arith.constant 0 : i32
    %c0_i32_0 = arith.constant 0 : i32
    %c0_i32_1 = arith.constant 0 : i32
    return %c0_i32, %c0_i32_0 : i32, i32
  }
  func.func @transform_3(%arg0: i32) -> (i32, i32) {
    %c0_i32 = arith.constant 0 : i32
    %c0_i32_0 = arith.constant 0 : i32
    %c0_i32_1 = arith.constant 0 : i32
    return %c0_i32, %c0_i32_0 : i32, i32
  }
  func.func @transform_4(%arg0: i32) -> (i32, i32) {
    %c0_i32 = arith.constant 0 : i32
    %c0_i32_0 = arith.constant 0 : i32
    %c0_i32_1 = arith.constant 0 : i32
    return %c0_i32, %c0_i32_0 : i32, i32
  }
  func.func @transform_5(%arg0: i32) -> (i32, i32) {
    %c0_i32 = arith.constant 0 : i32
    %c0_i32_0 = arith.constant 0 : i32
    return %arg0, %c0_i32 : i32, i32
  }
  func.func @transform_6(%arg0: i32) -> (i32, i32) {
    %c0_i32 = arith.constant 0 : i32
    %c0_i32_0 = arith.constant 0 : i32
    return %arg0, %c0_i32 : i32, i32
  }
}

</mosaic_0001>

<bundles_post_ra>
// kernel: appnp_forward.3
= control target key start
LH: loop header
LB: loop body
LE: loop exit
PB: predicated region body
PF: predicated region fallthrough
CT: control target
= control target key end

     0   :  { %s2203_s0 = inlined_call_operand.vmem [shape: bf16[256,256], index: 0, kind: input, shape index: {}]   ;;  %s2204_s2 = inlined_call_operand.vmem [shape: f32[256,128], index: 2, kind: output, shape index: {}]   ;;  %s2205_s1 = inlined_call_operand.vmem [shape: f32[256,128], index: 1, kind: input, shape index: {}]  }
   0x1   :  { %v1326_v0 = vld [vmem:[%s2203_s0] sm:$0xff]  ;;  %v1331_v1 = vld [vmem:[%s2203_s0 + $0x8] sm:$0xff]  ;;  %v1336_v2 = vld [vmem:[%s2203_s0 + $0x10] sm:$0xff] }
   0x2   :  { %2249 = vst [vmem:[#allocation2_spill] sm:$0xff] %v1326_v0  ;;  %2250 = vst [vmem:[#allocation3_spill] sm:$0xff] %v1331_v1  ;;  %v1341_v3 = vld [vmem:[%s2203_s0 + $0x18] sm:$0xff]  ;;  %v1346_v4 = vld [vmem:[%s2203_s0 + $0x20] sm:$0xff] }
   0x3   :  { %2251 = vst [vmem:[#allocation4_spill] sm:$0xff] %v1336_v2  ;;  %2252 = vst [vmem:[#allocation5_spill] sm:$0xff] %v1341_v3  ;;  %v1351_v5 = vld [vmem:[%s2203_s0 + $0x28] sm:$0xff]  ;;  %v1356_v6 = vld [vmem:[%s2203_s0 + $0x30] sm:$0xff] }
   0x4   :  { %2253 = vst [vmem:[#allocation6_spill] sm:$0xff] %v1346_v4  ;;  %2254 = vst [vmem:[#allocation7_spill] sm:$0xff] %v1351_v5  ;;  %v1361_v7 = vld [vmem:[%s2203_s0 + $0x38] sm:$0xff]  ;;  %v1366_v8 = vld [vmem:[%s2203_s0 + $0x40] sm:$0xff] }
   0x5   :  { %2255 = vst [vmem:[#allocation8_spill] sm:$0xff] %v1356_v6  ;;  %2256 = vst [vmem:[#allocation9_spill] sm:$0xff] %v1361_v7  ;;  %v1371_v9 = vld [vmem:[%s2203_s0 + $0x48] sm:$0xff]  ;;  %v1376_v10 = vld [vmem:[%s2203_s0 + $0x50] sm:$0xff] }
   0x6   :  { %2257 = vst [vmem:[#allocation10_spill] sm:$0xff] %v1366_v8  ;;  %2258 = vst [vmem:[#allocation11_spill] sm:$0xff] %v1371_v9  ;;  %v1381_v11 = vld [vmem:[%s2203_s0 + $0x58] sm:$0xff]  ;;  %v1386_v12 = vld [vmem:[%s2203_s0 + $0x60] sm:$0xff] }
   0x7   :  { %2259 = vst [vmem:[#allocation12_spill] sm:$0xff] %v1376_v10  ;;  %2260 = vst [vmem:[#allocation13_spill] sm:$0xff] %v1381_v11  ;;  %v1391_v13 = vld [vmem:[%s2203_s0 + $0x68] sm:$0xff]  ;;  %v1396_v14 = vld [vmem:[%s2203_s0 + $0x70] sm:$0xff] }
   0x8   :  { %2261 = vst [vmem:[#allocation14_spill] sm:$0xff] %v1386_v12  ;;  %2262 = vst [vmem:[#allocation15_spill] sm:$0xff] %v1391_v13  ;;  %v1401_v15 = vld [vmem:[%s2203_s0 + $0x78] sm:$0xff]  ;;  %v1406_v16 = vld [vmem:[%s2203_s0 + $0x80] sm:$0xff] }
   0x9   :  { %2263 = vst [vmem:[#allocation16_spill] sm:$0xff] %v1396_v14  ;;  %2264 = vst [vmem:[#allocation17_spill] sm:$0xff] %v1401_v15  ;;  %v1411_v17 = vld [vmem:[%s2203_s0 + $0x88] sm:$0xff]  ;;  %v1416_v18 = vld [vmem:[%s2203_s0 + $0x90] sm:$0xff] }
   0xa   :  { %2265 = vst [vmem:[#allocation18_spill] sm:$0xff] %v1406_v16  ;;  %2266 = vst [vmem:[#allocation19_spill] sm:$0xff] %v1411_v17  ;;  %v1421_v19 = vld [vmem:[%s2203_s0 + $0x98] sm:$0xff]  ;;  %v1426_v20 = vld [vmem:[%s2203_s0 + $0xa0] sm:$0xff] }
   0xb   :  { %2267 = vst [vmem:[#allocation20_spill] sm:$0xff] %v1416_v18  ;;  %2268 = vst [vmem:[#allocation21_spill] sm:$0xff] %v1421_v19  ;;  %v1431_v21 = vld [vmem:[%s2203_s0 + $0xa8] sm:$0xff]  ;;  %v1436_v22 = vld [vmem:[%s2203_s0 + $0xb0] sm:$0xff] }
   0xc   :  { %2269 = vst [vmem:[#allocation22_spill] sm:$0xff] %v1426_v20  ;;  %2270 = vst [vmem:[#allocation23_spill] sm:$0xff] %v1431_v21  ;;  %v1441_v23 = vld [vmem:[%s2203_s0 + $0xb8] sm:$0xff]  ;;  %v1446_v24 = vld [vmem:[%s2203_s0 + $0xc0] sm:$0xff] }
   0xd   :  { %2271 = vst [vmem:[#allocation24_spill] sm:$0xff] %v1436_v22  ;;  %2272 = vst [vmem:[#allocation25_spill] sm:$0xff] %v1441_v23  ;;  %v1451_v25 = vld [vmem:[%s2203_s0 + $0xc8] sm:$0xff]  ;;  %v1456_v26 = vld [vmem:[%s2203_s0 + $0xd0] sm:$0xff] }
   0xe   :  { %2273 = vst [vmem:[#allocation26_spill] sm:$0xff] %v1446_v24  ;;  %2274 = vst [vmem:[#allocation27_spill] sm:$0xff] %v1451_v25  ;;  %v1461_v27 = vld [vmem:[%s2203_s0 + $0xd8] sm:$0xff]  ;;  %v1466_v28 = vld [vmem:[%s2203_s0 + $0xe0] sm:$0xff] }
   0xf   :  { %2275 = vst [vmem:[#allocation28_spill] sm:$0xff] %v1456_v26  ;;  %2276 = vst [vmem:[#allocation29_spill] sm:$0xff] %v1461_v27  ;;  %v1471_v29 = vld [vmem:[%s2203_s0 + $0xe8] sm:$0xff]  ;;  %v1476_v30 = vld [vmem:[%s2203_s0 + $0xf0] sm:$0xff] }
  0x10   :  { %2277 = vst [vmem:[#allocation30_spill] sm:$0xff] %v1466_v28  ;;  %2278 = vst [vmem:[#allocation31_spill] sm:$0xff] %v1471_v29  ;;  %v1481_v31 = vld [vmem:[%s2203_s0 + $0xf8] sm:$0xff]  ;;  %v1486_v32 = vld [vmem:[%s2205_s1] sm:$0xff]  }
  0x11   :  { %2279 = vst [vmem:[#allocation32_spill] sm:$0xff] %v1476_v30  ;;  %2280 = vst [vmem:[#allocation33_spill] sm:$0xff] %v1481_v31  ;;  %v1491_v33 = vld [vmem:[%s2205_s1 + $0x8] sm:$0xff]   ;;  %v1496_v34 = vld [vmem:[%s2205_s1 + $0x10] sm:$0xff]   ;;  %v1504_v36 = vmul.f32 0.1, %v1486_v32 }
  0x12   :  { %v1501_v35 = vld [vmem:[%s2205_s1 + $0x18] sm:$0xff]   ;;  %v1509_v37 = vld [vmem:[%s2205_s1 + $0x20] sm:$0xff]   ;;  %v1512_v38 = vmul.f32 0.1, %v1491_v33  ;;  %v1517_v39 = vld [vmem:[%s2205_s1 + $0x28] sm:$0xff]  }
  0x13   :  { %2281 = vst [vmem:[#allocation34_spill] sm:$0xff] %v1504_v36  ;;  %v1520_v40 = vmul.f32 0.1, %v1496_v34  ;;  %v1525_v41 = vld [vmem:[%s2205_s1 + $0x30] sm:$0xff]   ;;  %v1528_v42 = vmul.f32 0.1, %v1501_v35 }
  0x14   :  { %2282 = vst [vmem:[#allocation35_spill] sm:$0xff] %v1512_v38  ;;  %v1533_v43 = vld [vmem:[%s2205_s1 + $0x38] sm:$0xff]   ;;  %v1538_v44 = vld [vmem:[%s2205_s1 + $0x40] sm:$0xff]   ;;  %v1541_v45 = vmul.f32 0.1, %v1509_v37  ;;  %v1546_v46 = vld [vmem:[%s2205_s1 + $0x48] sm:$0xff]  }
  0x15   :  { %2283 = vst [vmem:[#allocation36_spill] sm:$0xff] %v1520_v40  ;;  %2284 = vst [vmem:[#allocation37_spill] sm:$0xff] %v1528_v42  ;;  %v1551_v47 = vld [vmem:[%s2205_s1 + $0x50] sm:$0xff]   ;;  %v1556_v48 = vld [vmem:[%s2205_s1 + $0x58] sm:$0xff]   ;;  %v1559_v49 = vmul.f32 0.1, %v1517_v39 }
  0x16   :  { %2285 = vst [vmem:[#allocation38_spill] sm:$0xff] %v1541_v45  ;;  %v1564_v50 = vld [vmem:[%s2205_s1 + $0x60] sm:$0xff]   ;;  %v57_v51 = vld [vmem:[%s2205_s1 + $0x68] sm:$0xff]   ;;  %v58_v52 = vld [vmem:[%s2205_s1 + $0x70] sm:$0xff]   ;;  %v1573_v53 = vmul.f32 0.1, %v1525_v41 }
  0x17   :  { %2286 = vst [vmem:[#allocation39_spill] sm:$0xff] %v1559_v49  ;;  %v59_v54 = vld [vmem:[%s2205_s1 + $0x78] sm:$0xff]   ;;  %v60_v55 = vld [vmem:[%s2205_s1 + $0x80] sm:$0xff]   ;;  %v61_v56 = vld [vmem:[%s2205_s1 + $0x88] sm:$0xff]   ;;  %v1585_v57 = vmul.f32 0.1, %v1533_v43 }
  0x18   :  { %2287 = vst [vmem:[#allocation40_spill] sm:$0xff] %v1573_v53  ;;  %v62_v58 = vld [vmem:[%s2205_s1 + $0x90] sm:$0xff]   ;;  %v63_v59 = vld [vmem:[%s2205_s1 + $0x98] sm:$0xff]   ;;  %v64_v60 = vld [vmem:[%s2205_s1 + $0xa0] sm:$0xff]   ;;  %v1597_v61 = vmul.f32 0.1, %v1538_v44 }
  0x19   :  { %2288 = vst [vmem:[#allocation41_spill] sm:$0xff] %v1585_v57  ;;  %v65_v62 = vld [vmem:[%s2205_s1 + $0xa8] sm:$0xff]   ;;  %v66_v63 = vld [vmem:[%s2205_s1 + $0xb0] sm:$0xff]   ;;  %v67_v57 = vld [vmem:[%s2205_s1 + $0xb8] sm:$0xff]   ;;  %v1609_v53 = vmul.f32 0.1, %v1546_v46 }
  0x1a   :  { %2289 = vst [vmem:[#allocation42_spill] sm:$0xff] %v1597_v61  ;;  %v68_v49 = vld [vmem:[%s2205_s1 + $0xc0] sm:$0xff]   ;;  %v69_v61 = vld [vmem:[%s2205_s1 + $0xc8] sm:$0xff]   ;;  %v70_v45 = vld [vmem:[%s2205_s1 + $0xd0] sm:$0xff]   ;;  %v1621_v42 = vmul.f32 0.1, %v1551_v47 }
  0x1b   :  { %2290 = vst [vmem:[#allocation43_spill] sm:$0xff] %v1609_v53  ;;  %v1624_v40 = vmul.f32 0.1, %v1556_v48  ;;  %v71_v53 = vld [vmem:[%s2205_s1 + $0xd8] sm:$0xff]   ;;  %v72_v38 = vld [vmem:[%s2205_s1 + $0xe0] sm:$0xff]   ;;  %v73_v36 = vld [vmem:[%s2205_s1 + $0xe8] sm:$0xff]  }
  0x1c   :  { %2291 = vst [vmem:[#allocation44_spill] sm:$0xff] %v1621_v42  ;;  %v1636_v30 = vmul.f32 0.1, %v1564_v50  ;;  %v1638_v31 = vmul.f32 0.1, %v57_v51  ;;  %v75_v14 = vld [vmem:[%s2205_s1 + $0xf8] sm:$0xff]  }
  0x1d   :  { %2292 = vst [vmem:[#allocation45_spill] sm:$0xff] %v1624_v40  ;;  %v1640_v42 = vmul.f32 0.1, %v58_v52  ;;  %v74_v40 = vld [vmem:[%s2205_s1 + $0xf0] sm:$0xff]   ;;  %v1648_v15 = vmul.f32 0.1, %v59_v54 }
  0x1e   :  { %2293 = vst [vmem:[#allocation46_spill] sm:$0xff] %v1636_v30  ;;  %2294 = vst [vmem:[#allocation47_spill] sm:$0xff] %v1638_v31  ;;  %v1650_v28 = vmul.f32 0.1, %v60_v55  ;;  %v1652_v29 = vmul.f32 0.1, %v61_v56 }
  0x1f   :  { %2295 = vst [vmem:[#allocation48_spill] sm:$0xff] %v1640_v42  ;;  %2296 = vst [vmem:[#allocation49_spill] sm:$0xff] %v1648_v15  ;;  %v1654_v12 = vmul.f32 0.1, %v62_v58  ;;  %v1656_v30 = vmul.f32 0.1, %v63_v59 }
  0x20   :  { %2297 = vst [vmem:[#allocation50_spill] sm:$0xff] %v1650_v28  ;;  %2298 = vst [vmem:[#allocation51_spill] sm:$0xff] %v1652_v29  ;;  %v1658_v31 = vmul.f32 0.1, %v64_v60  ;;  %v1660_v42 = vmul.f32 0.1, %v65_v62 }
  0x21   :  { %2299 = vst [vmem:[#allocation52_spill] sm:$0xff] %v1654_v12  ;;  %2300 = vst [vmem:[#allocation53_spill] sm:$0xff] %v1656_v30  ;;  %v1662_v13 = vmul.f32 0.1, %v66_v63  ;;  %v1664_v26 = vmul.f32 0.1, %v67_v57 }
  0x22   :  { %2301 = vst [vmem:[#allocation54_spill] sm:$0xff] %v1658_v31  ;;  %2302 = vst [vmem:[#allocation55_spill] sm:$0xff] %v1660_v42  ;;  %v1666_v27 = vmul.f32 0.1, %v68_v49  ;;  %v1668_v10 = vmul.f32 0.1, %v69_v61 }
  0x23   :  { %2303 = vst [vmem:[#allocation56_spill] sm:$0xff] %v1662_v13  ;;  %2304 = vst [vmem:[#allocation57_spill] sm:$0xff] %v1664_v26  ;;  %v1670_v15 = vmul.f32 0.1, %v70_v45  ;;  %v1672_v28 = vmul.f32 0.1, %v71_v53 }
  0x24   :  { %2305 = vst [vmem:[#allocation58_spill] sm:$0xff] %v1666_v27  ;;  %2306 = vst [vmem:[#allocation59_spill] sm:$0xff] %v1668_v10  ;;  %v1674_v29 = vmul.f32 0.1, %v72_v38  ;;  %v1676_v12 = vmul.f32 0.1, %v73_v36 }
  0x25   :  { %2307 = vst [vmem:[#allocation60_spill] sm:$0xff] %v1670_v15  ;;  %2308 = vst [vmem:[#allocation61_spill] sm:$0xff] %v1672_v28  ;;  %v1678_v30 = vmul.f32 0.1, %v74_v40  ;;  %v1680_v31 = vmul.f32 0.1, %v75_v14 }
  0x26   :  { %2309 = vst [vmem:[#allocation62_spill] sm:$0xff] %v1674_v29  ;;  %2310 = vst [vmem:[#allocation63_spill] sm:$0xff] %v1676_v12  ;;  %s1759_s1 = smov 0  }
  0x27   :  { %2311 = vst [vmem:[#allocation64_spill] sm:$0xff] %v1678_v30  ;;  %2312 = vst [vmem:[#allocation65_spill] sm:$0xff] %v1680_v31 }
  0x28 LB: > { %v2313_v25 = vld [vmem:[#allocation27_spill] sm:$0xff]  ;;  %v2314_v24 = vld [vmem:[#allocation26_spill] sm:$0xff]  ;;  %v2315_v23 = vld [vmem:[#allocation25_spill] sm:$0xff]  ;;  %v154_v31 = vpack.c.bf16 %v1234_v56, %v1238_v55  ;;  %v146_v30 = vpack.c.bf16 %v1298_v33, %v1302_v32  ;;  %v155_v12 = vpack.c.bf16 %v1226_v59, %v1230_v58  ;;  %v147_v29 = vpack.c.bf16 %v1290_v35, %v1294_v34  ;;  %s113_s23 = sadd.s32 1, %s1306_s1   ;;  %v1258_v48 = vphi %v1556_v48, %v2439_v48   ;;  %v1254_v50 = vphi %v1564_v50, %v2438_v50   ;;  %v1250_v51 = vphi %v57_v51, %v2437_v51   ;;  %v1246_v52 = vphi %v58_v52, %v2436_v52   ;;  %v1242_v54 = vphi %v59_v54, %v2435_v54   ;;  %v1238_v55 = vphi %v60_v55, %v2434_v55   ;;  %v1234_v56 = vphi %v61_v56, %v2433_v56   ;;  %v1230_v58 = vphi %v62_v58, %v2432_v58   ;;  %v1226_v59 = vphi %v63_v59, %v2431_v59   ;;  %v1222_v60 = vphi %v64_v60, %v2430_v60   ;;  %v1218_v62 = vphi %v65_v62, %v2429_v62   ;;  %v1214_v63 = vphi %v66_v63, %v2428_v63   ;;  %v1210_v57 = vphi %v67_v57, %v2427_v57   ;;  %v1206_v49 = vphi %v68_v49, %v2426_v49   ;;  %v1202_v61 = vphi %v69_v61, %v2425_v61   ;;  %v1198_v45 = vphi %v70_v45, %v2424_v45   ;;  %v1194_v53 = vphi %v71_v53, %v2423_v53   ;;  %v1190_v38 = vphi %v72_v38, %v2422_v38   ;;  %v1186_v36 = vphi %v73_v36, %v2421_v36   ;;  %v1182_v40 = vphi %v74_v40, %v2420_v40   ;;  %v1178_v14 = vphi %v75_v14, %v2419_v14   ;;  %s1306_s1 = sphi %s1759_s1, %s2451_s1   ;;  %v1302_v32 = vphi %v1486_v32, %v2450_v32   ;;  %v1298_v33 = vphi %v1491_v33, %v2449_v33   ;;  %v1294_v34 = vphi %v1496_v34, %v2448_v34   ;;  %v1290_v35 = vphi %v1501_v35, %v2447_v35   ;;  %v1286_v37 = vphi %v1509_v37, %v2446_v37   ;;  %v1282_v39 = vphi %v1517_v39, %v2445_v39   ;;  %v1278_v41 = vphi %v1525_v41, %v2444_v41   ;;  %v1274_v43 = vphi %v1533_v43, %v2443_v43   ;;  %v1270_v44 = vphi %v1538_v44, %v2442_v44   ;;  %v1266_v46 = vphi %v1546_v46, %v2441_v46   ;;  %v1262_v47 = vphi %v1551_v47, %v2440_v47  }
  0x29   : > { %v2316_v22 = vld [vmem:[#allocation24_spill] sm:$0xff]  ;;  %v2317_v21 = vld [vmem:[#allocation23_spill] sm:$0xff]  ;;  %v2318_v20 = vld [vmem:[#allocation22_spill] sm:$0xff]  ;;  %v156_v28 = vpack.c.bf16 %v1218_v62, %v1222_v60  ;;  %v148_v15 = vpack.c.bf16 %v1282_v39, %v1286_v37  ;;  %v157_v10 = vpack.c.bf16 %v1210_v57, %v1214_v63  ;;  %v149_v27 = vpack.c.bf16 %v1274_v43, %v1278_v41  ;;  %p1973_p0 = scmp.ge.s32.totalorder %s113_s23, 10   ;;  %s2451_s1 = smov %s113_s23 }
  0x2a   : > { %v2319_v19 = vld [vmem:[#allocation21_spill] sm:$0xff]  ;;  %v2320_v18 = vld [vmem:[#allocation20_spill] sm:$0xff]  ;;  %v2321_v17 = vld [vmem:[#allocation19_spill] sm:$0xff]  ;;  %652 = vmatprep.subr.bf16.mxu0 %v154_v31  ;;  %764 = vmatprep.subr.bf16.mxu1 %v154_v31  ;;  %v158_v32 = vpack.c.bf16 %v1202_v61, %v1206_v49  ;;  %v150_v31 = vpack.c.bf16 %v1266_v46, %v1270_v44  ;;  %v153_v33 = vpack.c.bf16 %v1242_v54, %v1246_v52 }
  0x2b   : > { %v2322_v16 = vld [vmem:[#allocation18_spill] sm:$0xff]  ;;  %v2323_v11 = vld [vmem:[#allocation13_spill] sm:$0xff]  ;;  %v2324_v9 = vld [vmem:[#allocation11_spill] sm:$0xff]  ;;  %653 = vmatpush3.bf16.msra.mxu0 %v146_v30  ;;  %772 = vmatpush3.bf16.msra.mxu1 %v146_v30  ;;  %v159_v30 = vpack.c.bf16 %v1194_v53, %v1198_v45  ;;  %v640_v43 = vcombine.low %v2318_v20, %v2317_v21  ;;  %v643_v45 = vcombine.high %v2316_v22, %v2315_v23 }
  0x2c   : > { %v2325_v8 = vld [vmem:[#allocation10_spill] sm:$0xff]  ;;  %v2326_v7 = vld [vmem:[#allocation9_spill] sm:$0xff]  ;;  %v2327_v6 = vld [vmem:[#allocation8_spill] sm:$0xff]  ;;  %654 = vmatprep.subr.bf16.mxu0 %v155_v12  ;;  %765 = vmatprep.subr.bf16.mxu1 %v155_v12  ;;  %v636_v35 = vcombine.low %v2322_v16, %v2321_v17  ;;  %v645_v49 = vcombine.high %v2314_v24, %v2313_v25 }
  0x2d   : > { %v2328_v5 = vld [vmem:[#allocation7_spill] sm:$0xff]  ;;  %v2329_v4 = vld [vmem:[#allocation6_spill] sm:$0xff]  ;;  %v2330_v3 = vld [vmem:[#allocation5_spill] sm:$0xff]  ;;  %v627_v44 = vcombine.high %v2327_v6, %v2326_v7  ;;  %v626_v46 = vcombine.low %v2327_v6, %v2326_v7 }
  0x2e   : > { %v2331_v2 = vld [vmem:[#allocation4_spill] sm:$0xff]  ;;  %v2332_v1 = vld [vmem:[#allocation3_spill] sm:$0xff]  ;;  %v2333_v0 = vld [vmem:[#allocation2_spill] sm:$0xff]  ;;  %v625_v39 = vcombine.high %v2329_v4, %v2328_v5  ;;  %v624_v41 = vcombine.low %v2329_v4, %v2328_v5 }
  0x2f   : > { %655 = vmatpush3.bf16.msra.mxu0 %v147_v29  ;;  %773 = vmatpush3.bf16.msra.mxu1 %v147_v29  ;;  %v621_v12 = vcombine.high %v2333_v0, %v2332_v1  ;;  %v637_v29 = vcombine.high %v2322_v16, %v2321_v17  ;;  %v620_v34 = vcombine.low %v2333_v0, %v2332_v1  ;;  %v2334_v52 = vld [vmem:[#allocation12_spill] sm:$0xff]  ;;  %v2336_v54 = vld [vmem:[#allocation29_spill] sm:$0xff]  ;;  %v2340_v59 = vld [vmem:[#allocation15_spill] sm:$0xff] }
  0x30   : > { %656 = vmatprep.subr.bf16.mxu0 %v156_v28  ;;  %766 = vmatprep.subr.bf16.mxu1 %v156_v28  ;;  %v151_v28 = vpack.c.bf16 %v1258_v48, %v1262_v47  ;;  %v622_v37 = vcombine.low %v2331_v2, %v2330_v3  ;;  %v642_v47 = vcombine.low %v2316_v22, %v2315_v23  ;;  %v2338_v55 = vld [vmem:[#allocation28_spill] sm:$0xff]  ;;  %v2342_v60 = vld [vmem:[#allocation14_spill] sm:$0xff]  ;;  %v2344_v62 = vld [vmem:[#allocation31_spill] sm:$0xff] }
  0x31   : > { %354 = vmatprep.mubr.bf16.mxu0 %v621_v12  ;;  %418 = vmatprep.mubr.bf16.mxu1 %v637_v29  ;;  %v629_v48 = vcombine.high %v2325_v8, %v2324_v9  ;;  %v631_v53 = vcombine.high %v2334_v52, %v2323_v11  ;;  %v2339_v12 = vmov %v2338_v55  ;;  %v647_v56 = vcombine.high %v2338_v55, %v2336_v54  ;;  %v2346_v63 = vld [vmem:[#allocation30_spill] sm:$0xff]  ;;  %v2378_v42 = vld [vmem:[#allocation55_spill] sm:$0xff]  ;;  %v2382_v13 = vld [vmem:[#allocation56_spill] sm:$0xff] }
  0x32   : > { %v2341_v29 = vmov %v2340_v59  ;;  %v633_v61 = vcombine.high %v2342_v60, %v2340_v59  ;;  %v2386_v26 = vld [vmem:[#allocation57_spill] sm:$0xff] }
  0x33   : > { %657 = vmatpush3.bf16.msra.mxu0 %v148_v15  ;;  %774 = vmatpush3.bf16.msra.mxu1 %v148_v15  ;;  %v152_v15 = vpack.c.bf16 %v1250_v51, %v1254_v50  ;;  %v628_v50 = vcombine.low %v2325_v8, %v2324_v9  ;;  %v644_v51 = vcombine.low %v2314_v24, %v2313_v25 }
  0x34   : > { %658 = vmatprep.subr.bf16.mxu0 %v157_v10  ;;  %767 = vmatprep.subr.bf16.mxu1 %v157_v10  ;;  %v160_v10 = vpack.c.bf16 %v1186_v36, %v1190_v38  ;;  %v623_v36 = vcombine.high %v2331_v2, %v2330_v3  ;;  %v638_v38 = vcombine.low %v2320_v18, %v2319_v19 }
  0x37   : > { %659 = vmatpush3.bf16.msra.mxu0 %v149_v27  ;;  %775 = vmatpush3.bf16.msra.mxu1 %v149_v27  ;;  %v161_v27 = vpack.c.bf16 %v1178_v14, %v1182_v40  ;;  %v639_v14 = vcombine.high %v2320_v18, %v2319_v19  ;;  %v641_v40 = vcombine.high %v2318_v20, %v2317_v21 }
  0x38   : > { %660 = vmatprep.subr.bf16.mxu0 %v158_v32  ;;  %768 = vmatprep.subr.bf16.mxu1 %v158_v32  ;;  %v649_v32 = vcombine.high %v2346_v63, %v2344_v62 }
  0x3b   : > { %661 = vmatpush3.bf16.msra.mxu0 %v150_v31  ;;  %776 = vmatpush3.bf16.msra.mxu1 %v150_v31  ;;  %v2335_v31 = vmov %v2334_v52  ;;  %v2356_v52 = vld [vmem:[#allocation34_spill] sm:$0xff] }
  0x3c   : > { %662 = vmatprep.subr.bf16.mxu0 %v159_v30  ;;  %769 = vmatprep.subr.bf16.mxu1 %v159_v30  ;;  %v2337_v30 = vmov %v2336_v54  ;;  %v630_v57 = vcombine.low %v2335_v31, %v2323_v11 }
  0x3d   : > { %v646_v58 = vcombine.low %v2339_v12, %v2337_v30 }
  0x3f   : > { %663 = vmatpush3.bf16.msra.mxu0 %v151_v28  ;;  %777 = vmatpush3.bf16.msra.mxu1 %v151_v28  ;;  %v2343_v28 = vmov %v2342_v60 }
  0x40   : > { %664 = vmatprep.subr.bf16.mxu0 %v160_v10  ;;  %770 = vmatprep.subr.bf16.mxu1 %v160_v10  ;;  %v2345_v10 = vmov %v2344_v62 }
  0x43   : > { %665 = vmatpush3.bf16.msra.mxu0 %v152_v15  ;;  %778 = vmatpush3.bf16.msra.mxu1 %v152_v15  ;;  %v2347_v15 = vmov %v2346_v63 }
  0x44   : > { %666 = vmatprep.subr.bf16.mxu0 %v161_v27  ;;  %771 = vmatprep.subr.bf16.mxu1 %v161_v27  ;;  %v632_v27 = vcombine.low %v2343_v28, %v2341_v29 }
  0x47   : > { %667 = vmatpush3.bf16.msra.mxu0 %v153_v33  ;;  %779 = vmatpush3.bf16.msra.mxu1 %v153_v33  ;;  %v648_v33 = vcombine.low %v2347_v15, %v2345_v10 }
  0x4a   : > { %355 = vmatmul.mubr.bf16.vlgmr.msra.gmra.mrb[0].mxu0 %v620_v34  ;;  %419 = vmatmul.mubr.bf16.vlgmr.msra.gmra.mrb[0].mxu1 %v636_v35  ;;  %v2348_v34 = vld [vmem:[#allocation17_spill] sm:$0xff]  ;;  %v2350_v35 = vld [vmem:[#allocation16_spill] sm:$0xff] }
  0x4b   : > { %362 = vmatprep.mubr.bf16.mxu0 %v623_v36  ;;  %426 = vmatprep.mubr.bf16.mxu1 %v639_v14  ;;  %v2349_v0 = vmov %v2348_v34  ;;  %v2351_v1 = vmov %v2350_v35  ;;  %v635_v36 = vcombine.high %v2350_v35, %v2348_v34  ;;  %v2352_v14 = vld [vmem:[#allocation33_spill] sm:$0xff] }
  0x4c   : > { %v2353_v2 = vmov %v2352_v14 }
  0x52   : > { %363 = vmatmul.mubr.bf16.gmra.mrb[4].mxu0 %v622_v37  ;;  %427 = vmatmul.mubr.bf16.gmra.mrb[4].mxu1 %v638_v38  ;;  %v2354_v37 = vld [vmem:[#allocation32_spill] sm:$0xff] }
  0x53   : > { %370 = vmatprep.mubr.bf16.mxu0 %v625_v39  ;;  %434 = vmatprep.mubr.bf16.mxu1 %v641_v40  ;;  %v2355_v3 = vmov %v2354_v37  ;;  %v651_v38 = vcombine.high %v2354_v37, %v2352_v14  ;;  %v634_v39 = vcombine.low %v2351_v1, %v2349_v0  ;;  %v2364_v37 = vld [vmem:[#allocation36_spill] sm:$0xff] }
  0x54   : > { %v650_v40 = vcombine.low %v2355_v3, %v2353_v2 }
  0x5a   : > { %371 = vmatmul.mubr.bf16.gmra.mrb[8].mxu0 %v624_v41  ;;  %435 = vmatmul.mubr.bf16.gmra.mrb[8].mxu1 %v640_v43 }
  0x5b   : > { %378 = vmatprep.mubr.bf16.mxu0 %v627_v44  ;;  %442 = vmatprep.mubr.bf16.mxu1 %v643_v45 }
  0x62   : > { %379 = vmatmul.mubr.bf16.gmra.mrb[12].mxu0 %v626_v46  ;;  %443 = vmatmul.mubr.bf16.gmra.mrb[12].mxu1 %v642_v47 }
  0x63   : > { %386 = vmatprep.mubr.bf16.mxu0 %v629_v48  ;;  %450 = vmatprep.mubr.bf16.mxu1 %v645_v49 }
  0x6a   : > { %387 = vmatmul.mubr.bf16.gmra.mrb[16].mxu0 %v628_v50  ;;  %451 = vmatmul.mubr.bf16.gmra.mrb[16].mxu1 %v644_v51 }
  0x6b   : > { %394 = vmatprep.mubr.bf16.mxu0 %v631_v53  ;;  %458 = vmatprep.mubr.bf16.mxu1 %v647_v56  ;;  %v2358_v53 = vld [vmem:[#allocation50_spill] sm:$0xff] }
  0x72   : > { %395 = vmatmul.mubr.bf16.gmra.mrb[20].mxu0 %v630_v57  ;;  %459 = vmatmul.mubr.bf16.gmra.mrb[20].mxu1 %v646_v58  ;;  %v2360_v57 = vld [vmem:[#allocation35_spill] sm:$0xff] }
  0x73   : > { %402 = vmatprep.mubr.bf16.mxu0 %v633_v61  ;;  %466 = vmatprep.mubr.bf16.mxu1 %v649_v32  ;;  %v2362_v58 = vld [vmem:[#allocation51_spill] sm:$0xff] }
  0x7a   : > { %403 = vmatmul.mubr.bf16.gmra.mrb[24].mxu0 %v632_v27  ;;  %467 = vmatmul.mubr.bf16.gmra.mrb[24].mxu1 %v648_v33 }
  0x7b   : > { %410 = vmatprep.mubr.bf16.mxu0 %v635_v36  ;;  %474 = vmatprep.mubr.bf16.mxu1 %v651_v38  ;;  %v2366_v38 = vld [vmem:[#allocation52_spill] sm:$0xff] }
  0x82   : > { %411 = vmatmul.mubr.bf16.gmra.mrb[28].mxu0 %v634_v39  ;;  %475 = vmatmul.mubr.bf16.gmra.mrb[28].mxu1 %v650_v40  ;;  %v2368_v40 = vld [vmem:[#allocation37_spill] sm:$0xff] }
 0x11d   : > { %v668_v41 = vpop.f32.mrb[0].mxu0  ;;  %v716_v43 = vpop.f32.mrb[0].mxu1 }
 0x11e   : > { %v669_v44 = vpop.f32.mrb[1].mxu0  ;;  %v717_v45 = vpop.f32.mrb[1].mxu1 }
 0x11f   : > { %v670_v46 = vadd.f32 %v669_v44, %v668_v41  ;;  %v718_v47 = vadd.f32 %v717_v45, %v716_v43  ;;  %v671_v48 = vpop.f32.mrb[2].mxu0  ;;  %v719_v49 = vpop.f32.mrb[2].mxu1  ;;  %v2370_v41 = vld [vmem:[#allocation53_spill] sm:$0xff] }
 0x120   : > { %v672_v50 = vpop.f32.mrb[3].mxu0  ;;  %v720_v51 = vpop.f32.mrb[3].mxu1 }
 0x121   : > { %v1879_v32 = vadd.f32 %v670_v46, %v2356_v52   ;;  %v1882_v55 = vadd.f32 %v718_v47, %v2358_v53   ;;  %v673_v54 = vadd.f32 %v672_v50, %v671_v48  ;;  %v721_v56 = vadd.f32 %v720_v51, %v719_v49  ;;  %v2372_v53 = vld [vmem:[#allocation38_spill] sm:$0xff] }
 0x123   : > { %v2357_v27 = vmov %v1879_v32  ;;  %v2359_v0 = vmov %v1882_v55  ;;  %v1885_v33 = vadd.f32 %v673_v54, %v2360_v57   ;;  %v1888_v56 = vadd.f32 %v721_v56, %v2362_v58   ;;  %v2374_v54 = vld [vmem:[#allocation54_spill] sm:$0xff] }
 0x124   :  { %483 = vst [vmem:[%s2204_s2] sm:$0xff] (%p1973_p0), %v2357_v27  ;;  %499 = vst [vmem:[%s2204_s2 + $0x80] sm:$0xff] (%p1973_p0), %v2359_v0 }
 0x125   : > { %v2361_v1 = vmov %v1885_v33  ;;  %v2363_v2 = vmov %v1888_v56  ;;  %v674_v59 = vpop.f32.mrb[4].mxu0  ;;  %v722_v60 = vpop.f32.mrb[4].mxu1 }
 0x126   : > { %v675_v61 = vpop.f32.mrb[5].mxu0  ;;  %v723_v62 = vpop.f32.mrb[5].mxu1  ;;  %484 = vst [vmem:[%s2204_s2 + $0x8] sm:$0xff] (%p1973_p0), %v2361_v1  ;;  %500 = vst [vmem:[%s2204_s2 + $0x88] sm:$0xff] (%p1973_p0), %v2363_v2 }
 0x127   : > { %v676_v63 = vadd.f32 %v675_v61, %v674_v59  ;;  %v724_v34 = vadd.f32 %v723_v62, %v722_v60  ;;  %v677_v35 = vpop.f32.mrb[6].mxu0  ;;  %v725_v36 = vpop.f32.mrb[6].mxu1 }
 0x128   : > { %v678_v32 = vpop.f32.mrb[7].mxu0  ;;  %v726_v14 = vpop.f32.mrb[7].mxu1 }
 0x129   : > { %v1891_v55 = vadd.f32 %v676_v63, %v2364_v37   ;;  %v1894_v58 = vadd.f32 %v724_v34, %v2366_v38   ;;  %v679_v33 = vadd.f32 %v678_v32, %v677_v35  ;;  %v727_v39 = vadd.f32 %v726_v14, %v725_v36  ;;  %v2380_v38 = vld [vmem:[#allocation40_spill] sm:$0xff] }
 0x12b   : > { %v2365_v3 = vmov %v1891_v55  ;;  %v2367_v4 = vmov %v1894_v58  ;;  %v1897_v35 = vadd.f32 %v679_v33, %v2368_v40   ;;  %v1900_v59 = vadd.f32 %v727_v39, %v2370_v41   ;;  %v2376_v58 = vld [vmem:[#allocation39_spill] sm:$0xff] }
 0x12c   :  { %485 = vst [vmem:[%s2204_s2 + $0x10] sm:$0xff] (%p1973_p0), %v2365_v3  ;;  %501 = vst [vmem:[%s2204_s2 + $0x90] sm:$0xff] (%p1973_p0), %v2367_v4 }
 0x12d   : > { %v2369_v5 = vmov %v1897_v35  ;;  %v2371_v6 = vmov %v1900_v59  ;;  %v680_v43 = vpop.f32.mrb[8].mxu0  ;;  %v728_v44 = vpop.f32.mrb[8].mxu1 }
 0x12e   : > { %v681_v45 = vpop.f32.mrb[9].mxu0  ;;  %v729_v46 = vpop.f32.mrb[9].mxu1  ;;  %486 = vst [vmem:[%s2204_s2 + $0x18] sm:$0xff] (%p1973_p0), %v2369_v5  ;;  %502 = vst [vmem:[%s2204_s2 + $0x98] sm:$0xff] (%p1973_p0), %v2371_v6 }
 0x12f   : > { %v682_v47 = vadd.f32 %v681_v45, %v680_v43  ;;  %v730_v48 = vadd.f32 %v729_v46, %v728_v44  ;;  %v683_v49 = vpop.f32.mrb[10].mxu0  ;;  %v731_v50 = vpop.f32.mrb[10].mxu1 }
 0x130   : > { %v684_v51 = vpop.f32.mrb[11].mxu0  ;;  %v732_v52 = vpop.f32.mrb[11].mxu1 }
 0x131   : > { %v1903_v37 = vadd.f32 %v682_v47, %v2372_v53   ;;  %v1906_v60 = vadd.f32 %v730_v48, %v2374_v54   ;;  %v685_v56 = vadd.f32 %v684_v51, %v683_v49  ;;  %v733_v57 = vadd.f32 %v732_v52, %v731_v50  ;;  %v2388_v51 = vld [vmem:[#allocation42_spill] sm:$0xff] }
 0x132   : > { %v2390_v52 = vld [vmem:[#allocation58_spill] sm:$0xff] }
 0x133   : > { %v2373_v7 = vmov %v1903_v37  ;;  %v2375_v8 = vmov %v1906_v60  ;;  %v1909_v39 = vadd.f32 %v685_v56, %v2376_v58   ;;  %v1912_v62 = vadd.f32 %v733_v57, %v2378_v42   ;;  %v2392_v56 = vld [vmem:[#allocation43_spill] sm:$0xff] }
 0x134   :  { %487 = vst [vmem:[%s2204_s2 + $0x20] sm:$0xff] (%p1973_p0), %v2373_v7  ;;  %503 = vst [vmem:[%s2204_s2 + $0xa0] sm:$0xff] (%p1973_p0), %v2375_v8 }
 0x135   : > { %v2377_v9 = vmov %v1909_v39  ;;  %v2379_v10 = vmov %v1912_v62  ;;  %v686_v59 = vpop.f32.mrb[12].mxu0  ;;  %v734_v61 = vpop.f32.mrb[12].mxu1  ;;  %v2384_v39 = vld [vmem:[#allocation41_spill] sm:$0xff] }
 0x136   : > { %v687_v63 = vpop.f32.mrb[13].mxu0  ;;  %v735_v34 = vpop.f32.mrb[13].mxu1  ;;  %488 = vst [vmem:[%s2204_s2 + $0x28] sm:$0xff] (%p1973_p0), %v2377_v9  ;;  %504 = vst [vmem:[%s2204_s2 + $0xa8] sm:$0xff] (%p1973_p0), %v2379_v10 }
 0x137   : > { %v688_v35 = vadd.f32 %v687_v63, %v686_v59  ;;  %v736_v36 = vadd.f32 %v735_v34, %v734_v61  ;;  %v689_v32 = vpop.f32.mrb[14].mxu0  ;;  %v737_v14 = vpop.f32.mrb[14].mxu1 }
 0x138   : > { %v690_v37 = vpop.f32.mrb[15].mxu0  ;;  %v738_v55 = vpop.f32.mrb[15].mxu1 }
 0x139   : > { %v1915_v41 = vadd.f32 %v688_v35, %v2380_v38   ;;  %v1918_v63 = vadd.f32 %v736_v36, %v2382_v13   ;;  %v691_v60 = vadd.f32 %v690_v37, %v689_v32  ;;  %v739_v33 = vadd.f32 %v738_v55, %v737_v14  ;;  %v2396_v38 = vld [vmem:[#allocation44_spill] sm:$0xff] }
 0x13b   : > { %v2381_v11 = vmov %v1915_v41  ;;  %v2383_v12 = vmov %v1918_v63  ;;  %v1921_v43 = vadd.f32 %v691_v60, %v2384_v39   ;;  %v1924_v57 = vadd.f32 %v739_v33, %v2386_v26   ;;  %v2398_v60 = vld [vmem:[#allocation60_spill] sm:$0xff] }
 0x13c   :  { %489 = vst [vmem:[%s2204_s2 + $0x30] sm:$0xff] (%p1973_p0), %v2381_v11  ;;  %505 = vst [vmem:[%s2204_s2 + $0xb0] sm:$0xff] (%p1973_p0), %v2383_v12 }
 0x13d   : > { %v2385_v15 = vmov %v1921_v43  ;;  %v2387_v16 = vmov %v1924_v57  ;;  %v692_v62 = vpop.f32.mrb[16].mxu0  ;;  %v740_v40 = vpop.f32.mrb[16].mxu1  ;;  %v2394_v57 = vld [vmem:[#allocation59_spill] sm:$0xff] }
 0x13e   : > { %v693_v44 = vpop.f32.mrb[17].mxu0  ;;  %v741_v45 = vpop.f32.mrb[17].mxu1  ;;  %490 = vst [vmem:[%s2204_s2 + $0x38] sm:$0xff] (%p1973_p0), %v2385_v15  ;;  %506 = vst [vmem:[%s2204_s2 + $0xb8] sm:$0xff] (%p1973_p0), %v2387_v16 }
 0x13f   : > { %v694_v46 = vadd.f32 %v693_v44, %v692_v62  ;;  %v742_v47 = vadd.f32 %v741_v45, %v740_v40  ;;  %v695_v48 = vpop.f32.mrb[18].mxu0  ;;  %v743_v49 = vpop.f32.mrb[18].mxu1  ;;  %v2400_v62 = vld [vmem:[#allocation45_spill] sm:$0xff] }
 0x140   : > { %v696_v41 = vpop.f32.mrb[19].mxu0  ;;  %v744_v50 = vpop.f32.mrb[19].mxu1 }
 0x141   : > { %v1927_v44 = vadd.f32 %v694_v46, %v2388_v51   ;;  %v1930_v53 = vadd.f32 %v742_v47, %v2390_v52   ;;  %v697_v43 = vadd.f32 %v696_v41, %v695_v48  ;;  %v745_v54 = vadd.f32 %v744_v50, %v743_v49 }
 0x143   : > { %v2389_v13 = vmov %v1927_v44  ;;  %v2391_v17 = vmov %v1930_v53  ;;  %v1933_v46 = vadd.f32 %v697_v43, %v2392_v56   ;;  %v1936_v61 = vadd.f32 %v745_v54, %v2394_v57   ;;  %v2404_v54 = vld [vmem:[#allocation46_spill] sm:$0xff] }
 0x144   : > { %v2406_v56 = vld [vmem:[#allocation62_spill] sm:$0xff]  ;;  %491 = vst [vmem:[%s2204_s2 + $0x40] sm:$0xff] (%p1973_p0), %v2389_v13  ;;  %507 = vst [vmem:[%s2204_s2 + $0xc0] sm:$0xff] (%p1973_p0), %v2391_v17 }
 0x145   : > { %v2393_v18 = vmov %v1933_v46  ;;  %v2395_v19 = vmov %v1936_v61  ;;  %v698_v58 = vpop.f32.mrb[20].mxu0  ;;  %v746_v59 = vpop.f32.mrb[20].mxu1  ;;  %v2402_v61 = vld [vmem:[#allocation61_spill] sm:$0xff] }
 0x146   : > { %v699_v63 = vpop.f32.mrb[21].mxu0  ;;  %v747_v34 = vpop.f32.mrb[21].mxu1  ;;  %492 = vst [vmem:[%s2204_s2 + $0x48] sm:$0xff] (%p1973_p0), %v2393_v18  ;;  %508 = vst [vmem:[%s2204_s2 + $0xc8] sm:$0xff] (%p1973_p0), %v2395_v19 }
 0x147   : > { %v700_v35 = vadd.f32 %v699_v63, %v698_v58  ;;  %v748_v36 = vadd.f32 %v747_v34, %v746_v59  ;;  %v701_v32 = vpop.f32.mrb[22].mxu0  ;;  %v749_v14 = vpop.f32.mrb[22].mxu1  ;;  %v2408_v58 = vld [vmem:[#allocation47_spill] sm:$0xff] }
 0x148   : > { %v702_v37 = vpop.f32.mrb[23].mxu0  ;;  %v750_v55 = vpop.f32.mrb[23].mxu1 }
 0x149   : > { %v1939_v47 = vadd.f32 %v700_v35, %v2396_v38   ;;  %v1942_v45 = vadd.f32 %v748_v36, %v2398_v60   ;;  %v703_v33 = vadd.f32 %v702_v37, %v701_v32  ;;  %v751_v39 = vadd.f32 %v750_v55, %v749_v14 }
 0x14b   : > { %v2397_v20 = vmov %v1939_v47  ;;  %v2399_v21 = vmov %v1942_v45  ;;  %v1945_v48 = vadd.f32 %v703_v33, %v2400_v62   ;;  %v1948_v53 = vadd.f32 %v751_v39, %v2402_v61   ;;  %v2412_v39 = vld [vmem:[#allocation48_spill] sm:$0xff] }
 0x14c   :  { %493 = vst [vmem:[%s2204_s2 + $0x50] sm:$0xff] (%p1973_p0), %v2397_v20  ;;  %509 = vst [vmem:[%s2204_s2 + $0xd0] sm:$0xff] (%p1973_p0), %v2399_v21 }
 0x14d   : > { %v2401_v22 = vmov %v1945_v48  ;;  %v2403_v23 = vmov %v1948_v53  ;;  %v704_v40 = vpop.f32.mrb[24].mxu0  ;;  %v752_v44 = vpop.f32.mrb[24].mxu1  ;;  %v2410_v53 = vld [vmem:[#allocation63_spill] sm:$0xff] }
 0x14e   : > { %v705_v46 = vpop.f32.mrb[25].mxu0  ;;  %v753_v49 = vpop.f32.mrb[25].mxu1  ;;  %494 = vst [vmem:[%s2204_s2 + $0x58] sm:$0xff] (%p1973_p0), %v2401_v22  ;;  %510 = vst [vmem:[%s2204_s2 + $0xd8] sm:$0xff] (%p1973_p0), %v2403_v23 }
 0x14f   : > { %v706_v41 = vadd.f32 %v705_v46, %v704_v40  ;;  %v754_v50 = vadd.f32 %v753_v49, %v752_v44  ;;  %v707_v51 = vpop.f32.mrb[26].mxu0  ;;  %v755_v52 = vpop.f32.mrb[26].mxu1  ;;  %v2415_v44 = vld [vmem:[#allocation49_spill] sm:$0xff]  ;;  %v2426_v49 = vmov %v2391_v17  ;;  %v2441_v46 = vmov %v2393_v18 }
 0x150   : > { %v708_v47 = vpop.f32.mrb[27].mxu0  ;;  %v756_v43 = vpop.f32.mrb[27].mxu1 }
 0x151   : > { %v1951_v45 = vadd.f32 %v706_v41, %v2404_v54   ;;  %v1954_v38 = vadd.f32 %v754_v50, %v2406_v56   ;;  %v709_v48 = vadd.f32 %v708_v47, %v707_v51  ;;  %v757_v57 = vadd.f32 %v756_v43, %v755_v52 }
 0x152   : > { %v2433_v56 = vmov %v2363_v2  ;;  %v2440_v47 = vmov %v2397_v20  ;;  %v2443_v43 = vmov %v2385_v15  ;;  %v2444_v41 = vmov %v2381_v11 }
 0x153   : > { %v2405_v24 = vmov %v1951_v45  ;;  %v2407_v25 = vmov %v1954_v38  ;;  %v1957_v51 = vadd.f32 %v709_v48, %v2408_v58   ;;  %v1960_v36 = vadd.f32 %v757_v57, %v2410_v53   ;;  %v2413_v38 = vld [vmem:[#allocation64_spill] sm:$0xff] }
 0x154   : > { %v2423_v53 = vmov %v2403_v23  ;;  %v2424_v45 = vmov %v2399_v21  ;;  %v2427_v57 = vmov %v2387_v16  ;;  %v2432_v58 = vmov %v2367_v4  ;;  %495 = vst [vmem:[%s2204_s2 + $0x60] sm:$0xff] (%p1973_p0), %v2405_v24  ;;  %511 = vst [vmem:[%s2204_s2 + $0xe0] sm:$0xff] (%p1973_p0), %v2407_v25 }
 0x155   : > { %v2409_v26 = vmov %v1957_v51  ;;  %v2411_v28 = vmov %v1960_v36  ;;  %v710_v59 = vpop.f32.mrb[28].mxu0  ;;  %v758_v63 = vpop.f32.mrb[28].mxu1  ;;  %v2416_v36 = vld [vmem:[#allocation65_spill] sm:$0xff]  ;;  %v2438_v50 = vmov %v2405_v24  ;;  %v2439_v48 = vmov %v2401_v22 }
 0x156   : > { %v711_v34 = vpop.f32.mrb[29].mxu0  ;;  %v759_v35 = vpop.f32.mrb[29].mxu1  ;;  %v2437_v51 = vmov %v2409_v26  ;;  %496 = vst [vmem:[%s2204_s2 + $0x68] sm:$0xff] (%p1973_p0), %v2409_v26  ;;  %512 = vst [vmem:[%s2204_s2 + $0xe8] sm:$0xff] (%p1973_p0), %v2411_v28 }
 0x157   : > { %v712_v32 = vadd.f32 %v711_v34, %v710_v59  ;;  %v760_v14 = vadd.f32 %v759_v35, %v758_v63  ;;  %v713_v37 = vpop.f32.mrb[30].mxu0  ;;  %v761_v55 = vpop.f32.mrb[30].mxu1  ;;  %v2428_v63 = vmov %v2383_v12  ;;  %v2431_v59 = vmov %v2371_v6 }
 0x158   : > { %v714_v60 = vpop.f32.mrb[31].mxu0  ;;  %v762_v33 = vpop.f32.mrb[31].mxu1  ;;  %v2447_v35 = vmov %v2369_v5  ;;  %v2448_v34 = vmov %v2365_v3  ;;  %112 = sbr.rel (!%p1973_p0) target bundleno = 40 (0x28), region = 35 }
 0x159   : > { %v413_v29 = vadd.f32 %v712_v32, %v2412_v39   ;;  %v1964_v40 = vadd.f32 %v760_v14, %v2413_v38   ;;  %v715_v62 = vadd.f32 %v714_v60, %v713_v37  ;;  %v763_v61 = vadd.f32 %v762_v33, %v761_v55 }
 0x15a   : > { %v2422_v38 = vmov %v2407_v25  ;;  %v2430_v60 = vmov %v2375_v8  ;;  %v2434_v55 = vmov %v2359_v0  ;;  %v2445_v39 = vmov %v2377_v9 }
 0x15b   : > { %v2414_v30 = vmov %v1964_v40  ;;  %v416_v31 = vadd.f32 %v715_v62, %v2415_v44   ;;  %v1968_v14 = vadd.f32 %v763_v61, %v2416_v36   ;;  %v2421_v36 = vmov %v2411_v28  ;;  %497 = vst [vmem:[%s2204_s2 + $0x70] sm:$0xff] (%p1973_p0), %v413_v29 }
 0x15c   : > { %v2420_v40 = vmov %v2414_v30  ;;  %v2425_v61 = vmov %v2395_v19  ;;  %v2429_v62 = vmov %v2379_v10  ;;  %v2436_v52 = vmov %v413_v29  ;;  %513 = vst [vmem:[%s2204_s2 + $0xf0] sm:$0xff] (%p1973_p0), %v2414_v30 }
 0x15d   : > { %v2417_v42 = vmov %v1968_v14  ;;  %v2435_v54 = vmov %v416_v31  ;;  %v2442_v44 = vmov %v2389_v13  ;;  %v2446_v37 = vmov %v2373_v7  ;;  %498 = vst [vmem:[%s2204_s2 + $0x78] sm:$0xff] (%p1973_p0), %v416_v31 }
 0x15e   : > { %v2419_v14 = vmov %v2417_v42  ;;  %v2449_v33 = vmov %v2361_v1  ;;  %v2450_v32 = vmov %v2357_v27  ;;  %514 = vst [vmem:[%s2204_s2 + $0xf8] sm:$0xff] (%p1973_p0), %v2417_v42 }

// kernel: appnp_forward.2
= control target key start
LH: loop header
LB: loop body
LE: loop exit
PB: predicated region body
PF: predicated region fallthrough
CT: control target
= control target key end

     0   :  { %s1469_s1 = inlined_call_operand.vmem [shape: f32[128,128], index: 1, kind: input, shape index: {}]   ;;  %s1470_s0 = inlined_call_operand.vmem [shape: f32[256,128], index: 0, kind: input, shape index: {}]   ;;  %s1471_s3 = inlined_call_operand.vmem [shape: f32[128,128], index: 3, kind: input, shape index: {}]   ;;  %s1472_s2 = inlined_call_operand.vmem [shape: f32[1,128], index: 2, kind: input, shape index: {}]   ;;  %s1473_s5 = inlined_call_operand.vmem [shape: f32[256,128], index: 5, kind: output, shape index: {0}]   ;;  %s1474_s4 = inlined_call_operand.vmem [shape: f32[1,128], index: 4, kind: input, shape index: {}]   ;;  %s1475_s6 = inlined_call_operand.vmem [shape: f32[256,128], index: 6, kind: output, shape index: {1}]  }
   0x1   :  { %v54_v0 = vld [vmem:[%s1469_s1] sm:$0xff]  ;;  %v55_v1 = vld [vmem:[%s1469_s1 + $0x8] sm:$0xff]  ;;  %v56_v2 = vld [vmem:[%s1469_s1 + $0x10] sm:$0xff] }
   0x2   :  { %v912_v3 = vpack.c.bf16 %v55_v1, %v54_v0  ;;  %v57_v4 = vld [vmem:[%s1469_s1 + $0x18] sm:$0xff]  ;;  %v58_v6 = vld [vmem:[%s1469_s1 + $0x20] sm:$0xff]  ;;  %v59_v7 = vld [vmem:[%s1469_s1 + $0x28] sm:$0xff] }
   0x3   :  { %v916_v5 = vpack.c.bf16 %v57_v4, %v56_v2  ;;  %v920_v8 = vpack.c.bf16 %v59_v7, %v58_v6  ;;  %v22_v9 = vld [vmem:[%s1470_s0] sm:$0xff]  ;;  %v60_v10 = vld [vmem:[%s1469_s1 + $0x30] sm:$0xff]  ;;  %v61_v11 = vld [vmem:[%s1469_s1 + $0x38] sm:$0xff] }
   0x4   :  { %913 = vmatprep.subr.bf16.mxu0 %v912_v3  ;;  %784 = vmatprep.mubr.f32.mxu0 %v22_v9  ;;  %v924_v12 = vpack.c.bf16 %v61_v11, %v60_v10  ;;  %v62_v13 = vld [vmem:[%s1469_s1 + $0x40] sm:$0xff]  ;;  %v63_v14 = vld [vmem:[%s1469_s1 + $0x48] sm:$0xff]  ;;  %v64_v16 = vld [vmem:[%s1469_s1 + $0x50] sm:$0xff] }
   0x5   :  { %915 = vmatpush3.bf16.msra.mxu0 %v912_v3  ;;  %v928_v15 = vpack.c.bf16 %v63_v14, %v62_v13  ;;  %v65_v17 = vld [vmem:[%s1469_s1 + $0x58] sm:$0xff]  ;;  %v366_v18 = vld [vmem:[%s1471_s3] sm:$0xff]  ;;  %v367_v19 = vld [vmem:[%s1471_s3 + $0x8] sm:$0xff] }
   0x6   :  { %917 = vmatprep.subr.bf16.mxu0 %v916_v5  ;;  %v368_v20 = vld [vmem:[%s1471_s3 + $0x10] sm:$0xff]  ;;  %v932_v21 = vpack.c.bf16 %v65_v17, %v64_v16  ;;  %v66_v22 = vld [vmem:[%s1469_s1 + $0x60] sm:$0xff]  ;;  %v944_v23 = vpack.c.bf16 %v367_v19, %v366_v18  ;;  %v369_v24 = vld [vmem:[%s1471_s3 + $0x18] sm:$0xff] }
   0x7   :  { %v67_v25 = vld [vmem:[%s1469_s1 + $0x68] sm:$0xff]  ;;  %v948_v26 = vpack.c.bf16 %v369_v24, %v368_v20  ;;  %v370_v27 = vld [vmem:[%s1471_s3 + $0x20] sm:$0xff]  ;;  %v68_v30 = vld [vmem:[%s1469_s1 + $0x70] sm:$0xff] }
   0x8   :  { %v371_v28 = vld [vmem:[%s1471_s3 + $0x28] sm:$0xff]  ;;  %945 = vmatprep.subr.bf16.mxu1 %v944_v23  ;;  %v936_v29 = vpack.c.bf16 %v67_v25, %v66_v22  ;;  %v69_v32 = vld [vmem:[%s1469_s1 + $0x78] sm:$0xff]  ;;  %v372_v33 = vld [vmem:[%s1471_s3 + $0x30] sm:$0xff] }
   0x9   :  { %919 = vmatpush3.bf16.msra.mxu0 %v916_v5  ;;  %947 = vmatpush3.bf16.msra.mxu1 %v944_v23  ;;  %v952_v31 = vpack.c.bf16 %v371_v28, %v370_v27  ;;  %v373_v34 = vld [vmem:[%s1471_s3 + $0x38] sm:$0xff]  ;;  %v940_v35 = vpack.c.bf16 %v69_v32, %v68_v30  ;;  %v374_v37 = vld [vmem:[%s1471_s3 + $0x40] sm:$0xff]  ;;  %v375_v38 = vld [vmem:[%s1471_s3 + $0x48] sm:$0xff] }
   0xa   :  { %921 = vmatprep.subr.bf16.mxu0 %v920_v8  ;;  %949 = vmatprep.subr.bf16.mxu1 %v948_v26  ;;  %v956_v36 = vpack.c.bf16 %v373_v34, %v372_v33  ;;  %v960_v39 = vpack.c.bf16 %v375_v38, %v374_v37  ;;  %v376_v40 = vld [vmem:[%s1471_s3 + $0x50] sm:$0xff]  ;;  %v377_v41 = vld [vmem:[%s1471_s3 + $0x58] sm:$0xff]  ;;  %v23_v42 = vld [vmem:[%s1470_s0 + $0x8] sm:$0xff] }
   0xb   :  { %v24_v43 = vld [vmem:[%s1470_s0 + $0x10] sm:$0xff]  ;;  %v964_v44 = vpack.c.bf16 %v377_v41, %v376_v40  ;;  %v378_v45 = vld [vmem:[%s1471_s3 + $0x60] sm:$0xff]  ;;  %v379_v46 = vld [vmem:[%s1471_s3 + $0x68] sm:$0xff] }
   0xc   :  { %v25_v47 = vld [vmem:[%s1470_s0 + $0x18] sm:$0xff]  ;;  %v26_v48 = vld [vmem:[%s1470_s0 + $0x20] sm:$0xff]  ;;  %v968_v49 = vpack.c.bf16 %v379_v46, %v378_v45  ;;  %v27_v50 = vld [vmem:[%s1470_s0 + $0x28] sm:$0xff] }
   0xd   :  { %923 = vmatpush3.bf16.msra.mxu0 %v920_v8  ;;  %951 = vmatpush3.bf16.msra.mxu1 %v948_v26  ;;  %v28_v51 = vld [vmem:[%s1470_s0 + $0x30] sm:$0xff]  ;;  %v29_v52 = vld [vmem:[%s1470_s0 + $0x38] sm:$0xff]  ;;  %v30_v53 = vld [vmem:[%s1470_s0 + $0x40] sm:$0xff] }
   0xe   :  { %925 = vmatprep.subr.bf16.mxu0 %v924_v12  ;;  %953 = vmatprep.subr.bf16.mxu1 %v952_v31  ;;  %v31_v54 = vld [vmem:[%s1470_s0 + $0x48] sm:$0xff]  ;;  %v32_v55 = vld [vmem:[%s1470_s0 + $0x50] sm:$0xff]  ;;  %v33_v56 = vld [vmem:[%s1470_s0 + $0x58] sm:$0xff] }
   0xf   :  { %v34_v57 = vld [vmem:[%s1470_s0 + $0x60] sm:$0xff]  ;;  %v35_v58 = vld [vmem:[%s1470_s0 + $0x68] sm:$0xff]  ;;  %v36_v59 = vld [vmem:[%s1470_s0 + $0x70] sm:$0xff] }
  0x10   :  { %v37_v60 = vld [vmem:[%s1470_s0 + $0x78] sm:$0xff]  ;;  %v38_v61 = vld [vmem:[%s1470_s0 + $0x80] sm:$0xff]  ;;  %v39_v62 = vld [vmem:[%s1470_s0 + $0x88] sm:$0xff] }
  0x11   :  { %927 = vmatpush3.bf16.msra.mxu0 %v924_v12  ;;  %955 = vmatpush3.bf16.msra.mxu1 %v952_v31  ;;  %v40_v63 = vld [vmem:[%s1470_s0 + $0x90] sm:$0xff]  ;;  %v41_v0 = vld [vmem:[%s1470_s0 + $0x98] sm:$0xff]  ;;  %v42_v1 = vld [vmem:[%s1470_s0 + $0xa0] sm:$0xff] }
  0x12   :  { %929 = vmatprep.subr.bf16.mxu0 %v928_v15  ;;  %957 = vmatprep.subr.bf16.mxu1 %v956_v36  ;;  %v43_v2 = vld [vmem:[%s1470_s0 + $0xa8] sm:$0xff]  ;;  %v44_v3 = vld [vmem:[%s1470_s0 + $0xb0] sm:$0xff]  ;;  %v45_v4 = vld [vmem:[%s1470_s0 + $0xb8] sm:$0xff] }
  0x13   :  { %v46_v5 = vld [vmem:[%s1470_s0 + $0xc0] sm:$0xff]  ;;  %v47_v6 = vld [vmem:[%s1470_s0 + $0xc8] sm:$0xff]  ;;  %v48_v7 = vld [vmem:[%s1470_s0 + $0xd0] sm:$0xff] }
  0x14   :  { %v49_v8 = vld [vmem:[%s1470_s0 + $0xd8] sm:$0xff]  ;;  %v50_v9 = vld [vmem:[%s1470_s0 + $0xe0] sm:$0xff]  ;;  %v51_v10 = vld [vmem:[%s1470_s0 + $0xe8] sm:$0xff] }
  0x15   :  { %931 = vmatpush3.bf16.msra.mxu0 %v928_v15  ;;  %959 = vmatpush3.bf16.msra.mxu1 %v956_v36  ;;  %v52_v11 = vld [vmem:[%s1470_s0 + $0xf0] sm:$0xff]  ;;  %v53_v12 = vld [vmem:[%s1470_s0 + $0xf8] sm:$0xff]  ;;  %v1206_v16 = vld [vmem:[%s1472_s2] ss:$0 sm:$0xff] }
  0x16   :  { %933 = vmatprep.subr.bf16.mxu0 %v932_v21  ;;  %961 = vmatprep.subr.bf16.mxu1 %v960_v39  ;;  %v380_v13 = vld [vmem:[%s1471_s3 + $0x70] sm:$0xff]  ;;  %v381_v14 = vld [vmem:[%s1471_s3 + $0x78] sm:$0xff] }
  0x17   :  { %v972_v15 = vpack.c.bf16 %v381_v14, %v380_v13 }
  0x19   :  { %935 = vmatpush3.bf16.msra.mxu0 %v932_v21  ;;  %963 = vmatpush3.bf16.msra.mxu1 %v960_v39 }
  0x1a   :  { %937 = vmatprep.subr.bf16.mxu0 %v936_v29  ;;  %965 = vmatprep.subr.bf16.mxu1 %v964_v44 }
  0x1d   :  { %939 = vmatpush3.bf16.msra.mxu0 %v936_v29  ;;  %967 = vmatpush3.bf16.msra.mxu1 %v964_v44 }
  0x1e   :  { %941 = vmatprep.subr.bf16.mxu0 %v940_v35  ;;  %969 = vmatprep.subr.bf16.mxu1 %v968_v49 }
  0x21   :  { %943 = vmatpush3.bf16.msra.mxu0 %v940_v35  ;;  %971 = vmatpush3.bf16.msra.mxu1 %v968_v49 }
  0x22   :  { %973 = vmatprep.subr.bf16.mxu1 %v972_v15 }
  0x24   :  { %785 = vmatmul.mubr.f32.vlgmr.msra.gmra.mrb[0].mxu0 %v23_v42 }
  0x25   :  { %787 = vmatprep.mubr.f32.mxu0 %v24_v43  ;;  %975 = vmatpush3.bf16.msra.mxu1 %v972_v15 }
  0x28   :  { %788 = vmatmul.mubr.f32.gmra.mrb[2].mxu0 %v25_v47 }
  0x29   :  { %790 = vmatprep.mubr.f32.mxu0 %v26_v48 }
  0x2c   :  { %791 = vmatmul.mubr.f32.gmra.mrb[4].mxu0 %v27_v50 }
  0x2d   :  { %793 = vmatprep.mubr.f32.mxu0 %v28_v51 }
  0x30   :  { %794 = vmatmul.mubr.f32.gmra.mrb[6].mxu0 %v29_v52 }
  0x31   :  { %796 = vmatprep.mubr.f32.mxu0 %v30_v53 }
  0x34   :  { %797 = vmatmul.mubr.f32.gmra.mrb[8].mxu0 %v31_v54 }
  0x35   :  { %799 = vmatprep.mubr.f32.mxu0 %v32_v55 }
  0x38   :  { %800 = vmatmul.mubr.f32.gmra.mrb[10].mxu0 %v33_v56 }
  0x39   :  { %802 = vmatprep.mubr.f32.mxu0 %v34_v57 }
  0x3c   :  { %803 = vmatmul.mubr.f32.gmra.mrb[12].mxu0 %v35_v58 }
  0x3d   :  { %805 = vmatprep.mubr.f32.mxu0 %v36_v59 }
  0x40   :  { %806 = vmatmul.mubr.f32.gmra.mrb[14].mxu0 %v37_v60 }
  0x41   :  { %808 = vmatprep.mubr.f32.mxu0 %v38_v61 }
  0x44   :  { %809 = vmatmul.mubr.f32.gmra.mrb[16].mxu0 %v39_v62 }
  0x45   :  { %811 = vmatprep.mubr.f32.mxu0 %v40_v63 }
  0x48   :  { %812 = vmatmul.mubr.f32.gmra.mrb[18].mxu0 %v41_v0 }
  0x49   :  { %814 = vmatprep.mubr.f32.mxu0 %v42_v1 }
  0x4c   :  { %815 = vmatmul.mubr.f32.gmra.mrb[20].mxu0 %v43_v2 }
  0x4d   :  { %817 = vmatprep.mubr.f32.mxu0 %v44_v3 }
  0x50   :  { %818 = vmatmul.mubr.f32.gmra.mrb[22].mxu0 %v45_v4 }
  0x51   :  { %820 = vmatprep.mubr.f32.mxu0 %v46_v5 }
  0x54   :  { %821 = vmatmul.mubr.f32.gmra.mrb[24].mxu0 %v47_v6 }
  0x55   :  { %823 = vmatprep.mubr.f32.mxu0 %v48_v7 }
  0x58   :  { %824 = vmatmul.mubr.f32.gmra.mrb[26].mxu0 %v49_v8 }
  0x59   :  { %826 = vmatprep.mubr.f32.mxu0 %v50_v9 }
  0x5c   :  { %827 = vmatmul.mubr.f32.gmra.mrb[28].mxu0 %v51_v10 }
  0x5d   :  { %829 = vmatprep.mubr.f32.mxu0 %v52_v11 }
  0x60   :  { %830 = vmatmul.mubr.f32.gmra.mrb[30].mxu0 %v53_v12 }
  0xf7   :  { %v786_v17 = vpop.f32.mrb[0].mxu0 }
  0xf8   :  { %v149_v18 = vadd.f32 %v786_v17, %v1206_v16  ;;  %v143_v19 = vpop.f32.mrb[1].mxu0 }
  0xf9   :  { %v144_v20 = vadd.f32 %v1206_v16, %v143_v19 }
  0xfa   :  { %303 = vst [vmem:[%s1473_s5 + $0x8] sm:$0xff] %v149_v18  ;;  %v335_v23 = vmax.f32 %v149_v18, 0.0 }
  0xfb   :  { %302 = vst [vmem:[%s1473_s5] sm:$0xff] %v144_v20  ;;  %v789_v21 = vpop.f32.mrb[2].mxu0  ;;  %v334_v22 = vmax.f32 %v144_v20, 0.0 }
  0xfc   :  { %v159_v24 = vadd.f32 %v789_v21, %v1206_v16  ;;  %v153_v25 = vpop.f32.mrb[3].mxu0 }
  0xfd   :  { %v154_v26 = vadd.f32 %v1206_v16, %v153_v25  ;;  %864 = vmatprep.mubr.f32.mxu1 %v334_v22 }
  0xfe   :  { %305 = vst [vmem:[%s1473_s5 + $0x18] sm:$0xff] %v159_v24  ;;  %865 = vmatmul.mubr.f32.vlgmr.msra.gmra.mrb[0].mxu1 %v335_v23  ;;  %v337_v29 = vmax.f32 %v159_v24, 0.0 }
  0xff   :  { %304 = vst [vmem:[%s1473_s5 + $0x10] sm:$0xff] %v154_v26  ;;  %v336_v27 = vmax.f32 %v154_v26, 0.0  ;;  %v792_v28 = vpop.f32.mrb[4].mxu0 }
 0x100   :  { %v169_v30 = vadd.f32 %v792_v28, %v1206_v16  ;;  %v163_v31 = vpop.f32.mrb[5].mxu0 }
 0x101   :  { %v164_v32 = vadd.f32 %v1206_v16, %v163_v31  ;;  %867 = vmatprep.mubr.f32.mxu1 %v336_v27 }
 0x102   :  { %307 = vst [vmem:[%s1473_s5 + $0x28] sm:$0xff] %v169_v30  ;;  %868 = vmatmul.mubr.f32.gmra.mrb[2].mxu1 %v337_v29  ;;  %v339_v35 = vmax.f32 %v169_v30, 0.0 }
 0x103   :  { %306 = vst [vmem:[%s1473_s5 + $0x20] sm:$0xff] %v164_v32  ;;  %v338_v33 = vmax.f32 %v164_v32, 0.0  ;;  %v795_v34 = vpop.f32.mrb[6].mxu0 }
 0x104   :  { %v179_v36 = vadd.f32 %v795_v34, %v1206_v16  ;;  %v173_v37 = vpop.f32.mrb[7].mxu0 }
 0x105   :  { %v174_v38 = vadd.f32 %v1206_v16, %v173_v37  ;;  %870 = vmatprep.mubr.f32.mxu1 %v338_v33 }
 0x106   :  { %309 = vst [vmem:[%s1473_s5 + $0x38] sm:$0xff] %v179_v36  ;;  %871 = vmatmul.mubr.f32.gmra.mrb[4].mxu1 %v339_v35  ;;  %v341_v41 = vmax.f32 %v179_v36, 0.0 }
 0x107   :  { %308 = vst [vmem:[%s1473_s5 + $0x30] sm:$0xff] %v174_v38  ;;  %v340_v39 = vmax.f32 %v174_v38, 0.0  ;;  %v798_v40 = vpop.f32.mrb[8].mxu0 }
 0x108   :  { %v189_v42 = vadd.f32 %v798_v40, %v1206_v16  ;;  %v183_v43 = vpop.f32.mrb[9].mxu0 }
 0x109   :  { %v184_v44 = vadd.f32 %v1206_v16, %v183_v43  ;;  %873 = vmatprep.mubr.f32.mxu1 %v340_v39 }
 0x10a   :  { %311 = vst [vmem:[%s1473_s5 + $0x48] sm:$0xff] %v189_v42  ;;  %874 = vmatmul.mubr.f32.gmra.mrb[6].mxu1 %v341_v41  ;;  %v343_v47 = vmax.f32 %v189_v42, 0.0 }
 0x10b   :  { %310 = vst [vmem:[%s1473_s5 + $0x40] sm:$0xff] %v184_v44  ;;  %v342_v45 = vmax.f32 %v184_v44, 0.0  ;;  %v801_v46 = vpop.f32.mrb[10].mxu0 }
 0x10c   :  { %v199_v48 = vadd.f32 %v801_v46, %v1206_v16  ;;  %v193_v49 = vpop.f32.mrb[11].mxu0 }
 0x10d   :  { %v194_v50 = vadd.f32 %v1206_v16, %v193_v49  ;;  %876 = vmatprep.mubr.f32.mxu1 %v342_v45 }
 0x10e   :  { %313 = vst [vmem:[%s1473_s5 + $0x58] sm:$0xff] %v199_v48  ;;  %877 = vmatmul.mubr.f32.gmra.mrb[8].mxu1 %v343_v47  ;;  %v345_v53 = vmax.f32 %v199_v48, 0.0 }
 0x10f   :  { %312 = vst [vmem:[%s1473_s5 + $0x50] sm:$0xff] %v194_v50  ;;  %v344_v51 = vmax.f32 %v194_v50, 0.0  ;;  %v804_v52 = vpop.f32.mrb[12].mxu0  ;;  %v1339_v50 = vld [vmem:[%s1474_s4] ss:$0 sm:$0xff] }
 0x110   :  { %v209_v54 = vadd.f32 %v804_v52, %v1206_v16  ;;  %v203_v55 = vpop.f32.mrb[13].mxu0 }
 0x111   :  { %v204_v56 = vadd.f32 %v1206_v16, %v203_v55  ;;  %879 = vmatprep.mubr.f32.mxu1 %v344_v51 }
 0x112   :  { %315 = vst [vmem:[%s1473_s5 + $0x68] sm:$0xff] %v209_v54  ;;  %880 = vmatmul.mubr.f32.gmra.mrb[10].mxu1 %v345_v53  ;;  %v347_v59 = vmax.f32 %v209_v54, 0.0 }
 0x113   :  { %314 = vst [vmem:[%s1473_s5 + $0x60] sm:$0xff] %v204_v56  ;;  %v346_v57 = vmax.f32 %v204_v56, 0.0  ;;  %v807_v58 = vpop.f32.mrb[14].mxu0 }
 0x114   :  { %v219_v60 = vadd.f32 %v807_v58, %v1206_v16  ;;  %v213_v61 = vpop.f32.mrb[15].mxu0 }
 0x115   :  { %v214_v62 = vadd.f32 %v1206_v16, %v213_v61  ;;  %882 = vmatprep.mubr.f32.mxu1 %v346_v57 }
 0x116   :  { %317 = vst [vmem:[%s1473_s5 + $0x78] sm:$0xff] %v219_v60  ;;  %883 = vmatmul.mubr.f32.gmra.mrb[12].mxu1 %v347_v59  ;;  %v349_v1 = vmax.f32 %v219_v60, 0.0 }
 0x117   :  { %316 = vst [vmem:[%s1473_s5 + $0x70] sm:$0xff] %v214_v62  ;;  %v348_v63 = vmax.f32 %v214_v62, 0.0  ;;  %v810_v0 = vpop.f32.mrb[16].mxu0 }
 0x118   :  { %v229_v2 = vadd.f32 %v810_v0, %v1206_v16  ;;  %v223_v3 = vpop.f32.mrb[17].mxu0 }
 0x119   :  { %v224_v4 = vadd.f32 %v1206_v16, %v223_v3  ;;  %885 = vmatprep.mubr.f32.mxu1 %v348_v63 }
 0x11a   :  { %319 = vst [vmem:[%s1473_s5 + $0x88] sm:$0xff] %v229_v2  ;;  %886 = vmatmul.mubr.f32.gmra.mrb[14].mxu1 %v349_v1  ;;  %v351_v7 = vmax.f32 %v229_v2, 0.0 }
 0x11b   :  { %318 = vst [vmem:[%s1473_s5 + $0x80] sm:$0xff] %v224_v4  ;;  %v350_v5 = vmax.f32 %v224_v4, 0.0  ;;  %v813_v6 = vpop.f32.mrb[18].mxu0 }
 0x11c   :  { %v239_v8 = vadd.f32 %v813_v6, %v1206_v16  ;;  %v233_v9 = vpop.f32.mrb[19].mxu0 }
 0x11d   :  { %v234_v10 = vadd.f32 %v1206_v16, %v233_v9  ;;  %888 = vmatprep.mubr.f32.mxu1 %v350_v5 }
 0x11e   :  { %321 = vst [vmem:[%s1473_s5 + $0x98] sm:$0xff] %v239_v8  ;;  %889 = vmatmul.mubr.f32.gmra.mrb[16].mxu1 %v351_v7  ;;  %v353_v13 = vmax.f32 %v239_v8, 0.0 }
 0x11f   :  { %320 = vst [vmem:[%s1473_s5 + $0x90] sm:$0xff] %v234_v10  ;;  %v352_v11 = vmax.f32 %v234_v10, 0.0  ;;  %v816_v12 = vpop.f32.mrb[20].mxu0 }
 0x120   :  { %v249_v14 = vadd.f32 %v816_v12, %v1206_v16  ;;  %v243_v15 = vpop.f32.mrb[21].mxu0 }
 0x121   :  { %v244_v17 = vadd.f32 %v1206_v16, %v243_v15  ;;  %891 = vmatprep.mubr.f32.mxu1 %v352_v11 }
 0x122   :  { %323 = vst [vmem:[%s1473_s5 + $0xa8] sm:$0xff] %v249_v14  ;;  %892 = vmatmul.mubr.f32.gmra.mrb[18].mxu1 %v353_v13  ;;  %v355_v20 = vmax.f32 %v249_v14, 0.0 }
 0x123   :  { %322 = vst [vmem:[%s1473_s5 + $0xa0] sm:$0xff] %v244_v17  ;;  %v354_v18 = vmax.f32 %v244_v17, 0.0  ;;  %v819_v19 = vpop.f32.mrb[22].mxu0 }
 0x124   :  { %v259_v21 = vadd.f32 %v819_v19, %v1206_v16  ;;  %v253_v22 = vpop.f32.mrb[23].mxu0 }
 0x125   :  { %v254_v23 = vadd.f32 %v1206_v16, %v253_v22  ;;  %894 = vmatprep.mubr.f32.mxu1 %v354_v18 }
 0x126   :  { %325 = vst [vmem:[%s1473_s5 + $0xb8] sm:$0xff] %v259_v21  ;;  %895 = vmatmul.mubr.f32.gmra.mrb[20].mxu1 %v355_v20  ;;  %v357_v26 = vmax.f32 %v259_v21, 0.0 }
 0x127   :  { %324 = vst [vmem:[%s1473_s5 + $0xb0] sm:$0xff] %v254_v23  ;;  %v356_v24 = vmax.f32 %v254_v23, 0.0  ;;  %v822_v25 = vpop.f32.mrb[24].mxu0 }
 0x128   :  { %v269_v27 = vadd.f32 %v822_v25, %v1206_v16  ;;  %v263_v28 = vpop.f32.mrb[25].mxu0 }
 0x129   :  { %v264_v29 = vadd.f32 %v1206_v16, %v263_v28  ;;  %897 = vmatprep.mubr.f32.mxu1 %v356_v24 }
 0x12a   :  { %327 = vst [vmem:[%s1473_s5 + $0xc8] sm:$0xff] %v269_v27  ;;  %898 = vmatmul.mubr.f32.gmra.mrb[22].mxu1 %v357_v26  ;;  %v359_v32 = vmax.f32 %v269_v27, 0.0 }
 0x12b   :  { %326 = vst [vmem:[%s1473_s5 + $0xc0] sm:$0xff] %v264_v29  ;;  %v358_v30 = vmax.f32 %v264_v29, 0.0  ;;  %v825_v31 = vpop.f32.mrb[26].mxu0 }
 0x12c   :  { %v279_v33 = vadd.f32 %v825_v31, %v1206_v16  ;;  %v273_v34 = vpop.f32.mrb[27].mxu0 }
 0x12d   :  { %v274_v35 = vadd.f32 %v1206_v16, %v273_v34  ;;  %900 = vmatprep.mubr.f32.mxu1 %v358_v30 }
 0x12e   :  { %329 = vst [vmem:[%s1473_s5 + $0xd8] sm:$0xff] %v279_v33  ;;  %901 = vmatmul.mubr.f32.gmra.mrb[24].mxu1 %v359_v32  ;;  %v361_v38 = vmax.f32 %v279_v33, 0.0 }
 0x12f   :  { %328 = vst [vmem:[%s1473_s5 + $0xd0] sm:$0xff] %v274_v35  ;;  %v360_v36 = vmax.f32 %v274_v35, 0.0  ;;  %v828_v37 = vpop.f32.mrb[28].mxu0 }
 0x130   :  { %v289_v39 = vadd.f32 %v828_v37, %v1206_v16  ;;  %v283_v40 = vpop.f32.mrb[29].mxu0 }
 0x131   :  { %v284_v41 = vadd.f32 %v1206_v16, %v283_v40  ;;  %903 = vmatprep.mubr.f32.mxu1 %v360_v36 }
 0x132   :  { %331 = vst [vmem:[%s1473_s5 + $0xe8] sm:$0xff] %v289_v39  ;;  %904 = vmatmul.mubr.f32.gmra.mrb[26].mxu1 %v361_v38  ;;  %v363_v44 = vmax.f32 %v289_v39, 0.0 }
 0x133   :  { %330 = vst [vmem:[%s1473_s5 + $0xe0] sm:$0xff] %v284_v41  ;;  %v362_v42 = vmax.f32 %v284_v41, 0.0  ;;  %v831_v43 = vpop.f32.mrb[30].mxu0 }
 0x134   :  { %v299_v45 = vadd.f32 %v831_v43, %v1206_v16  ;;  %v293_v46 = vpop.f32.mrb[31].mxu0 }
 0x135   :  { %v294_v47 = vadd.f32 %v1206_v16, %v293_v46  ;;  %906 = vmatprep.mubr.f32.mxu1 %v362_v42 }
 0x136   :  { %333 = vst [vmem:[%s1473_s5 + $0xf8] sm:$0xff] %v299_v45  ;;  %907 = vmatmul.mubr.f32.gmra.mrb[28].mxu1 %v363_v44  ;;  %v365_v49 = vmax.f32 %v299_v45, 0.0 }
 0x137   :  { %332 = vst [vmem:[%s1473_s5 + $0xf0] sm:$0xff] %v294_v47  ;;  %v364_v48 = vmax.f32 %v294_v47, 0.0 }
 0x139   :  { %909 = vmatprep.mubr.f32.mxu1 %v364_v48 }
 0x13a   :  { %910 = vmatmul.mubr.f32.gmra.mrb[30].mxu1 %v365_v49 }
 0x1d1   :  { %v866_v16 = vpop.f32.mrb[0].mxu1 }
 0x1d2   :  { %v461_v51 = vadd.f32 %v866_v16, %v1339_v50  ;;  %v455_v52 = vpop.f32.mrb[1].mxu1 }
 0x1d3   :  { %v456_v53 = vadd.f32 %v1339_v50, %v455_v52 }
 0x1d4   :  { %615 = vst [vmem:[%s1475_s6 + $0x8] sm:$0xff] %v461_v51 }
 0x1d5   :  { %614 = vst [vmem:[%s1475_s6] sm:$0xff] %v456_v53  ;;  %v869_v54 = vpop.f32.mrb[2].mxu1 }
 0x1d6   :  { %v471_v55 = vadd.f32 %v869_v54, %v1339_v50  ;;  %v465_v56 = vpop.f32.mrb[3].mxu1 }
 0x1d7   :  { %v466_v57 = vadd.f32 %v1339_v50, %v465_v56 }
 0x1d8   :  { %617 = vst [vmem:[%s1475_s6 + $0x18] sm:$0xff] %v471_v55 }
 0x1d9   :  { %616 = vst [vmem:[%s1475_s6 + $0x10] sm:$0xff] %v466_v57  ;;  %v872_v58 = vpop.f32.mrb[4].mxu1 }
 0x1da   :  { %v481_v59 = vadd.f32 %v872_v58, %v1339_v50  ;;  %v475_v60 = vpop.f32.mrb[5].mxu1 }
 0x1db   :  { %v476_v61 = vadd.f32 %v1339_v50, %v475_v60 }
 0x1dc   :  { %619 = vst [vmem:[%s1475_s6 + $0x28] sm:$0xff] %v481_v59 }
 0x1dd   :  { %618 = vst [vmem:[%s1475_s6 + $0x20] sm:$0xff] %v476_v61  ;;  %v875_v62 = vpop.f32.mrb[6].mxu1 }
 0x1de   :  { %v491_v63 = vadd.f32 %v875_v62, %v1339_v50  ;;  %v485_v0 = vpop.f32.mrb[7].mxu1 }
 0x1df   :  { %v486_v1 = vadd.f32 %v1339_v50, %v485_v0 }
 0x1e0   :  { %621 = vst [vmem:[%s1475_s6 + $0x38] sm:$0xff] %v491_v63 }
 0x1e1   :  { %620 = vst [vmem:[%s1475_s6 + $0x30] sm:$0xff] %v486_v1  ;;  %v878_v2 = vpop.f32.mrb[8].mxu1 }
 0x1e2   :  { %v501_v3 = vadd.f32 %v878_v2, %v1339_v50  ;;  %v495_v4 = vpop.f32.mrb[9].mxu1 }
 0x1e3   :  { %v496_v5 = vadd.f32 %v1339_v50, %v495_v4 }
 0x1e4   :  { %623 = vst [vmem:[%s1475_s6 + $0x48] sm:$0xff] %v501_v3 }
 0x1e5   :  { %622 = vst [vmem:[%s1475_s6 + $0x40] sm:$0xff] %v496_v5  ;;  %v881_v6 = vpop.f32.mrb[10].mxu1 }
 0x1e6   :  { %v511_v7 = vadd.f32 %v881_v6, %v1339_v50  ;;  %v505_v8 = vpop.f32.mrb[11].mxu1 }
 0x1e7   :  { %v506_v9 = vadd.f32 %v1339_v50, %v505_v8 }
 0x1e8   :  { %625 = vst [vmem:[%s1475_s6 + $0x58] sm:$0xff] %v511_v7 }
 0x1e9   :  { %624 = vst [vmem:[%s1475_s6 + $0x50] sm:$0xff] %v506_v9  ;;  %v884_v10 = vpop.f32.mrb[12].mxu1 }
 0x1ea   :  { %v521_v11 = vadd.f32 %v884_v10, %v1339_v50  ;;  %v515_v12 = vpop.f32.mrb[13].mxu1 }
 0x1eb   :  { %v516_v13 = vadd.f32 %v1339_v50, %v515_v12 }
 0x1ec   :  { %627 = vst [vmem:[%s1475_s6 + $0x68] sm:$0xff] %v521_v11 }
 0x1ed   :  { %626 = vst [vmem:[%s1475_s6 + $0x60] sm:$0xff] %v516_v13  ;;  %v887_v14 = vpop.f32.mrb[14].mxu1 }
 0x1ee   :  { %v531_v15 = vadd.f32 %v887_v14, %v1339_v50  ;;  %v525_v17 = vpop.f32.mrb[15].mxu1 }
 0x1ef   :  { %v526_v18 = vadd.f32 %v1339_v50, %v525_v17 }
 0x1f0   :  { %629 = vst [vmem:[%s1475_s6 + $0x78] sm:$0xff] %v531_v15 }
 0x1f1   :  { %628 = vst [vmem:[%s1475_s6 + $0x70] sm:$0xff] %v526_v18  ;;  %v890_v19 = vpop.f32.mrb[16].mxu1 }
 0x1f2   :  { %v541_v20 = vadd.f32 %v890_v19, %v1339_v50  ;;  %v535_v21 = vpop.f32.mrb[17].mxu1 }
 0x1f3   :  { %v536_v22 = vadd.f32 %v1339_v50, %v535_v21 }
 0x1f4   :  { %631 = vst [vmem:[%s1475_s6 + $0x88] sm:$0xff] %v541_v20 }
 0x1f5   :  { %630 = vst [vmem:[%s1475_s6 + $0x80] sm:$0xff] %v536_v22  ;;  %v893_v23 = vpop.f32.mrb[18].mxu1 }
 0x1f6   :  { %v551_v24 = vadd.f32 %v893_v23, %v1339_v50  ;;  %v545_v25 = vpop.f32.mrb[19].mxu1 }
 0x1f7   :  { %v546_v26 = vadd.f32 %v1339_v50, %v545_v25 }
 0x1f8   :  { %633 = vst [vmem:[%s1475_s6 + $0x98] sm:$0xff] %v551_v24 }
 0x1f9   :  { %632 = vst [vmem:[%s1475_s6 + $0x90] sm:$0xff] %v546_v26  ;;  %v896_v27 = vpop.f32.mrb[20].mxu1 }
 0x1fa   :  { %v561_v28 = vadd.f32 %v896_v27, %v1339_v50  ;;  %v555_v29 = vpop.f32.mrb[21].mxu1 }
 0x1fb   :  { %v556_v30 = vadd.f32 %v1339_v50, %v555_v29 }
 0x1fc   :  { %635 = vst [vmem:[%s1475_s6 + $0xa8] sm:$0xff] %v561_v28 }
 0x1fd   :  { %634 = vst [vmem:[%s1475_s6 + $0xa0] sm:$0xff] %v556_v30  ;;  %v899_v31 = vpop.f32.mrb[22].mxu1 }
 0x1fe   :  { %v571_v32 = vadd.f32 %v899_v31, %v1339_v50  ;;  %v565_v33 = vpop.f32.mrb[23].mxu1 }
 0x1ff   :  { %v566_v34 = vadd.f32 %v1339_v50, %v565_v33 }
 0x200   :  { %637 = vst [vmem:[%s1475_s6 + $0xb8] sm:$0xff] %v571_v32 }
 0x201   :  { %636 = vst [vmem:[%s1475_s6 + $0xb0] sm:$0xff] %v566_v34  ;;  %v902_v35 = vpop.f32.mrb[24].mxu1 }
 0x202   :  { %v581_v36 = vadd.f32 %v902_v35, %v1339_v50  ;;  %v575_v37 = vpop.f32.mrb[25].mxu1 }
 0x203   :  { %v576_v38 = vadd.f32 %v1339_v50, %v575_v37 }
 0x204   :  { %639 = vst [vmem:[%s1475_s6 + $0xc8] sm:$0xff] %v581_v36 }
 0x205   :  { %638 = vst [vmem:[%s1475_s6 + $0xc0] sm:$0xff] %v576_v38  ;;  %v905_v39 = vpop.f32.mrb[26].mxu1 }
 0x206   :  { %v591_v40 = vadd.f32 %v905_v39, %v1339_v50  ;;  %v585_v41 = vpop.f32.mrb[27].mxu1 }
 0x207   :  { %v586_v42 = vadd.f32 %v1339_v50, %v585_v41 }
 0x208   :  { %641 = vst [vmem:[%s1475_s6 + $0xd8] sm:$0xff] %v591_v40 }
 0x209   :  { %640 = vst [vmem:[%s1475_s6 + $0xd0] sm:$0xff] %v586_v42  ;;  %v908_v43 = vpop.f32.mrb[28].mxu1 }
 0x20a   :  { %v601_v44 = vadd.f32 %v908_v43, %v1339_v50  ;;  %v595_v45 = vpop.f32.mrb[29].mxu1 }
 0x20b   :  { %v596_v46 = vadd.f32 %v1339_v50, %v595_v45 }
 0x20c   :  { %643 = vst [vmem:[%s1475_s6 + $0xe8] sm:$0xff] %v601_v44 }
 0x20d   :  { %642 = vst [vmem:[%s1475_s6 + $0xe0] sm:$0xff] %v596_v46  ;;  %v911_v47 = vpop.f32.mrb[30].mxu1 }
 0x20e   :  { %v611_v48 = vadd.f32 %v911_v47, %v1339_v50  ;;  %v605_v49 = vpop.f32.mrb[31].mxu1 }
 0x20f   :  { %v606_v16 = vadd.f32 %v1339_v50, %v605_v49 }
 0x210   :  { %645 = vst [vmem:[%s1475_s6 + $0xf8] sm:$0xff] %v611_v48 }
 0x211   :  { %644 = vst [vmem:[%s1475_s6 + $0xf0] sm:$0xff] %v606_v16 }

</bundles_post_ra>
